<compile_context>
chip_gen: v7x
topology: tpu7x:2x2x1
jax: 0.10.0
libtpu: 0.0.40
codegen_flags: <defaults>
</compile_context>

<pallas_src>
import functools

import jax
import jax.numpy as jnp
from jax.experimental import pallas as pl
from jax.experimental.pallas import tpu as pltpu


_TAPS = tuple((dy, dx) for dy in range(3) for dx in range(3))
_CENTER_TAP = 4          # (dy, dx) == (1, 1): zero shift, mask is all ones
_SUBLANE = 8             # f32 sublane tile


def _round_up(x, m):
    return (x + m - 1) // m * m


# ---------------------------------------------------------------------------
# pltpu.roll sign-convention probe (tiny one-off kernel, cached; the public
# wrapper runs it eagerly before entering any jit trace).
# ---------------------------------------------------------------------------
@functools.lru_cache(maxsize=None)
def _roll_matches_jnp_roll() -> bool:
    """True iff pltpu.roll(x, s, axis) == jnp.roll(x, s, axis)."""

    def probe(x_ref, o_ref):
        o_ref[...] = pltpu.roll(x_ref[...], 1, axis=1)

    try:
        x = jnp.broadcast_to(jnp.arange(128, dtype=jnp.int32), (8, 128))
        out = pl.pallas_call(
            probe, out_shape=jax.ShapeDtypeStruct((8, 128), jnp.int32))(x)
        # jnp.roll convention: out[0, 1] == x[0, 0] == 0 (opposite gives 2).
        return int(jax.device_get(out)[0, 1]) == 0
    except Exception:      # interpret/AOT-only environments: assume jnp conv.
        return True


@functools.lru_cache(maxsize=None)
def _tap_roll_shifts(W, M):
    """Static roll amounts so rolled[k] == x_flat[(k + s_tap) % M]."""
    sign = 1 if _roll_matches_jnp_roll() else -1
    shifts = []
    for dy, dx in _TAPS:
        s = (dy - 1) * W + (dx - 1)          # flat source offset of this tap
        shifts.append((sign * (-s)) % M)     # roll amount realizing x[k + s]
    return tuple(shifts)


def _tap_masks(H, W):
    """(9, H*W) f32 0/1 masks zeroing taps that fall outside the image."""
    k = jnp.arange(H * W, dtype=jnp.int32)
    r, c = k // W, k % W
    rows = []
    for dy, dx in _TAPS:
        oy, ox = dy - 1, dx - 1
        ok = (r + oy >= 0) & (r + oy < H) & (c + ox >= 0) & (c + ox < W)
        rows.append(ok.astype(jnp.float32))
    return jnp.stack(rows, axis=0)


def _pick_vmem_limit(needed_bytes):
    """VMEM limit from actual buffer sizes, capped at ~85% of physical VMEM."""
    try:
        cap = int(pltpu.get_tpu_info().vmem_capacity_bytes)
    except Exception:
        cap = 64 << 20                        # v7x per-TC VMEM (most restrictive)
    return int(min(max(needed_bytes, 32 << 20), int(cap * 0.85)))


# ---------------------------------------------------------------------------
# Fused kernel: conv3x3 + ReLU + conv3x3 + ReLU on a (C, M) channels-first
# slab (M = H*W, or N*H*W when the batch is folded into the lane axis).
# ---------------------------------------------------------------------------
def _fused_block_kernel(x_ref, w1_ref, b1_ref, w2_ref, b2_ref, m_ref, o_ref,
                        *, roll_shifts):

    def conv3x3_relu(act, w_ref, b_ref):
        # act: (C, M) f32.  "Same" padding = flat-axis roll + 0/1 border mask.
        # Per-tap MXU accumulation (no im2col scratch, no staging stores).
        acc = None
        for t in range(9):
            shift = roll_shifts[t]
            tap = act if shift == 0 else pltpu.roll(act, shift, axis=1)
            if t != _CENTER_TAP:                       # center mask == 1
                tap = tap * m_ref[t:t + 1, :]          # f32 VPU multiply
            contrib = jnp.dot(w_ref[t], tap.astype(jnp.bfloat16),
                              preferred_element_type=jnp.float32)
            acc = contrib if acc is None else acc + contrib
        return jnp.maximum(acc + b_ref[...], 0.0)      # bias + ReLU in f32

    x = x_ref[...].astype(jnp.float32)                 # (C_in_p, M)
    y1 = conv3x3_relu(x, w1_ref, b1_ref)               # conv1 + ReLU (in vregs)
    y2 = conv3x3_relu(y1, w2_ref, b2_ref)              # conv2 + ReLU
    o_ref[...] = y2.astype(o_ref.dtype)                # lane-dense store


@functools.partial(jax.jit, static_argnames=("fold_batch",))
def _block_forward_impl(x_nchw, params, *, fold_batch):
    w1, b1, w2, b2 = params                  # weights stored HWIO (3,3,Ci,Co)
    N, C_in, H, W = x_nchw.shape
    C_out = w1.shape[-1]
    L = H * W

    C_in_p = _round_up(C_in, _SUBLANE)       # sublane-aligned channel counts
    C_out_p = _round_up(C_out, _SUBLANE)
    M = N * L if fold_batch else L

    # --- tiny one-off param prep (VMEM-resident across the grid) -----------
    def prep_w(w, ci, ci_p):
        wt = w.reshape(9, ci, C_out).transpose(0, 2, 1)          # (9, Co, Ci)
        wt = jnp.pad(wt, ((0, 0), (0, C_out_p - C_out), (0, ci_p - ci)))
        return wt.astype(jnp.bfloat16)                           # MXU-native

    w1_k = prep_w(w1, C_in, C_in_p)
    w2_k = prep_w(w2, C_out, C_out_p)
    b1_k = jnp.pad(b1, (0, C_out_p - C_out)).astype(jnp.float32).reshape(C_out_p, 1)
    b2_k = jnp.pad(b2, (0, C_out_p - C_out)).astype(jnp.float32).reshape(C_out_p, 1)

    masks = _tap_masks(H, W)                                     # (9, L)
    if fold_batch:
        masks = jnp.tile(masks, (1, N))                          # (9, N*L)

    kernel = functools.partial(_fused_block_kernel,
                               roll_shifts=_tap_roll_shifts(W, M))

    # --- layout + specs -----------------------------------------------------
    if fold_batch:
        # One lane-dense (C, N*L) pass; masks kill cross-image roll leakage.
        x_k = x_nchw.transpose(1, 0, 2, 3).reshape(C_in, M)
        x_k = jnp.pad(x_k, ((0, C_in_p - C_in), (0, 0)))
        grid = (1,)
        x_spec = pl.BlockSpec((C_in_p, M), lambda i: (0, 0))
        o_spec = pl.BlockSpec((C_out_p, M), lambda i: (0, 0))
        out_shape = jax.ShapeDtypeStruct((C_out_p, M), x_nchw.dtype)
        w_map = lambda i: (0, 0, 0)
        v_map = lambda i: (0, 0)
    else:
        # One image per grid step; batch axis "parallel" (megacore sharding).
        x_k = x_nchw.reshape(N, C_in, L)                         # free reshape
        x_k = jnp.pad(x_k, ((0, 0), (0, C_in_p - C_in), (0, 0)))
        grid = (N,)
        x_spec = pl.BlockSpec((pl.Squeezed(), C_in_p, L), lambda n: (n, 0, 0))
        o_spec = pl.BlockSpec((pl.Squeezed(), C_out_p, L), lambda n: (n, 0, 0))
        out_shape = jax.ShapeDtypeStruct((N, C_out_p, L), x_nchw.dtype)
        w_map = lambda n: (0, 0, 0)
        v_map = lambda n: (0, 0)

    in_specs = [
        x_spec,
        pl.BlockSpec((9, C_out_p, C_in_p), w_map),
        pl.BlockSpec((C_out_p, 1), v_map),
        pl.BlockSpec((9, C_out_p, C_out_p), w_map),
        pl.BlockSpec((C_out_p, 1), v_map),
        pl.BlockSpec((9, M), v_map),
    ]

    # --- VMEM budget derived from actual buffer sizes ------------------------
    in_blk = C_in_p * M * 4
    out_blk = C_out_p * M * 4
    resident = ((w1_k.size + w2_k.size) * 2 + (b1_k.size + b2_k.size) * 4
                + masks.size * 4)
    live_vals = 10 * max(C_in_p, C_out_p) * M * 4        # taps/acc/y1/y2 slack
    needed = 2 * (in_blk + out_blk) + 2 * resident + live_vals + (4 << 20)

    out = pl.pallas_call(
        kernel,
        out_shape=out_shape,
        grid_spec=pltpu.PrefetchScalarGridSpec(
            num_scalar_prefetch=0,
            grid=grid,
            in_specs=in_specs,
            out_specs=o_spec,
        ),
        compiler_params=pltpu.CompilerParams(
            dimension_semantics=("parallel",),
            vmem_limit_bytes=_pick_vmem_limit(needed),
        ),
    )(x_k, w1_k, b1_k, w2_k, b2_k, masks)

    if fold_batch:
        out = out[:C_out].reshape(C_out, N, H, W).transpose(1, 0, 2, 3)
    else:
        out = out[:, :C_out, :].reshape(N, C_out, H, W)
    return out


def block_forward(x_nchw, params, fold_batch=None):
    """Block forward. x_nchw: (N, C_in, H, W) f32 -> (N, C_out, H, W) f32."""
    if fold_batch is None:
        N, C_in, H, W = x_nchw.shape
        C_out = params[0].shape[-1]
        footprint = (N * (_round_up(C_in, _SUBLANE) + _round_up(C_out, _SUBLANE))
                     * H * W * 4)
        fold_batch = footprint <= (4 << 20)   # tiny slabs: single lane-dense pass
    _roll_matches_jnp_roll()                  # warm the probe outside the jit trace
    return _block_forward_impl(x_nchw, params, fold_batch=bool(fold_batch))


def init_block_params(key, in_ch, out_ch):
    """Deterministic init mimicking nn.Conv2d defaults (uniform fan-in bounds)."""
    k1, k2, k3, k4 = jax.random.split(key, 4)
    bound1 = 1.0 / jnp.sqrt(in_ch * 9)
    bound2 = 1.0 / jnp.sqrt(out_ch * 9)
    # Weights stored HWIO: (3, 3, C_in, C_out)
    w1 = jax.random.uniform(k1, (3, 3, in_ch, out_ch), jnp.float32, -bound1, bound1)
    b1 = jax.random.uniform(k2, (out_ch,), jnp.float32, -bound1, bound1)
    w2 = jax.random.uniform(k3, (3, 3, out_ch, out_ch), jnp.float32, -bound2, bound2)
    b2 = jax.random.uniform(k4, (out_ch,), jnp.float32, -bound2, bound2)
    return (w1, b1, w2, b2)


def _reference_block(x_nchw, params):
    """Pure-JAX f32 reference (lax.conv) for the correctness check."""
    w1, b1, w2, b2 = params

    def conv(x, w, b):
        y = jax.lax.conv_general_dilated(
            x, w, window_strides=(1, 1), padding="SAME",
            dimension_numbers=("NCHW", "HWIO", "NCHW"))
        return jnp.maximum(y + b.reshape(1, -1, 1, 1), 0.0)

    return conv(conv(x_nchw, w1, b1), w2, b2)


if __name__ == "__main__":
    key = jax.random.PRNGKey(0)
    kx, kp = jax.random.split(key)

    N, in_ch, out_ch, H, W = 2, 4, 8, 16, 16
    x = jax.random.normal(kx, (N, in_ch, H, W), dtype=jnp.float32)
    params = init_block_params(kp, in_ch, out_ch)

    ref = _reference_block(x, params)

    # Default path at this tiny shape: whole batch folded into the lane axis.
    out = jax.block_until_ready(block_forward(x, params))
    assert out.shape == (N, out_ch, H, W), out.shape
    err = float(jnp.max(jnp.abs(out - ref)))
    # bf16 matmul operands vs f32 reference -> loosened tolerance.
    assert jnp.allclose(out, ref, rtol=3e-2, atol=3e-2), f"fold-path mismatch: {err}"

    # Per-image grid path (used at larger shapes): exercised for correctness too.
    out2 = jax.block_until_ready(block_forward(x, params, fold_batch=False))
    err2 = float(jnp.max(jnp.abs(out2 - ref)))
    assert jnp.allclose(out2, ref, rtol=3e-2, atol=3e-2), f"grid-path mismatch: {err2}"

    print("KERNEL_OK")
</pallas_src>

<mosaic_0001>
module attributes {stable_mosaic.version = 11 : i64} {
  func.func @probe(%arg0: memref<8x128xi32, #tpu.memory_space<vmem>>, %arg1: memref<8x128xi32, #tpu.memory_space<vmem>>) attributes {dimension_semantics = [], scalar_prefetch = 0 : i64, scratch_operands = 0 : i64, tpu.core_type = #tpu.core_type<tc>} {
    %c0 = arith.constant 0 : index
    %c0_0 = arith.constant 0 : index
    %0 = vector.load %arg0[%c0, %c0_0] : memref<8x128xi32, #tpu.memory_space<vmem>>, vector<8x128xi32>
    %c1_i32 = arith.constant 1 : i32
    %1 = tpu.dynamic_rotate %0 by %c1_i32 dim 1 : vector<8x128xi32>, i32 -> vector<8x128xi32>
    %c0_1 = arith.constant 0 : index
    %c0_2 = arith.constant 0 : index
    %2 = vector.load %arg1[%c0_1, %c0_2] : memref<8x128xi32, #tpu.memory_space<vmem>>, vector<8x128xi32>
    tpu.vector_store %arg1[%c0_1, %c0_2], %1 {strides = array<i32>} : memref<8x128xi32, #tpu.memory_space<vmem>>, vector<8x128xi32>,
    return
  }
}

module attributes {stable_mosaic.version = 11 : i64} {
  func.func @_fused_block_kernel(%arg0: i32, %arg1: memref<8x512xf32, #tpu.memory_space<vmem>>, %arg2: memref<9x8x8xbf16, #tpu.memory_space<vmem>>, %arg3: memref<8x1xf32, #tpu.memory_space<vmem>>, %arg4: memref<9x8x8xbf16, #tpu.memory_space<vmem>>, %arg5: memref<8x1xf32, #tpu.memory_space<vmem>>, %arg6: memref<9x512xf32, #tpu.memory_space<vmem>>, %arg7: memref<8x512xf32, #tpu.memory_space<vmem>>) attributes {dimension_semantics = [#tpu.dimension_semantics<parallel>], iteration_bounds = array<i64: 1>, scalar_prefetch = 0 : i64, scratch_operands = 0 : i64, tpu.core_type = #tpu.core_type<tc>, window_params = [{pipeline_mode = #tpu.pipeline_mode<synchronous>, transform_indices = @transform_0, window_bounds = array<i64: 8, 512>}, {pipeline_mode = #tpu.pipeline_mode<synchronous>, transform_indices = @transform_1, window_bounds = array<i64: 9, 8, 8>}, {pipeline_mode = #tpu.pipeline_mode<synchronous>, transform_indices = @transform_2, window_bounds = array<i64: 8, 1>}, {pipeline_mode = #tpu.pipeline_mode<synchronous>, transform_indices = @transform_3, window_bounds = array<i64: 9, 8, 8>}, {pipeline_mode = #tpu.pipeline_mode<synchronous>, transform_indices = @transform_4, window_bounds = array<i64: 8, 1>}, {pipeline_mode = #tpu.pipeline_mode<synchronous>, transform_indices = @transform_5, window_bounds = array<i64: 9, 512>}, {pipeline_mode = #tpu.pipeline_mode<synchronous>, transform_indices = @transform_6, window_bounds = array<i64: 8, 512>}]} {
    %c0 = arith.constant 0 : index
    %c0_0 = arith.constant 0 : index
    %0 = vector.load %arg1[%c0, %c0_0] : memref<8x512xf32, #tpu.memory_space<vmem>>, vector<8x512xf32>
    %c17_i32 = arith.constant 17 : i32
    %1 = tpu.dynamic_rotate %0 by %c17_i32 dim 1 : vector<8x512xf32>, i32 -> vector<8x512xf32>
    %c0_1 = arith.constant 0 : index
    %c0_2 = arith.constant 0 : index
    %2 = vector.load %arg6[%c0_1, %c0_2] : memref<9x512xf32, #tpu.memory_space<vmem>>, vector<1x512xf32>
    %3 = vector.broadcast %2 : vector<1x512xf32> to vector<8x512xf32>
    %4 = arith.mulf %1, %3 : vector<8x512xf32>
    %c0_3 = arith.constant 0 : index
    %c0_4 = arith.constant 0 : index
    %c0_5 = arith.constant 0 : index
    %5 = vector.load %arg2[%c0_3, %c0_4, %c0_5] : memref<9x8x8xbf16, #tpu.memory_space<vmem>>, vector<1x8x8xbf16>
    %6 = vector.shape_cast %5 : vector<1x8x8xbf16> to vector<8x8xbf16>
    %7 = arith.truncf %4 : vector<8x512xf32> to vector<8x512xbf16>
    %cst = arith.constant dense<0.000000e+00> : vector<8x512xf32>
    %8 = tpu.matmul %6, %7, %cst {dimension_numbers = #tpu.dot_dimension_numbers<[1], [0], [0], [1], [0, 0, 1, 1], [], []>} : vector<8x8xbf16>, vector<8x512xbf16>, vector<8x512xf32> -> vector<8x512xf32>
    %c16_i32 = arith.constant 16 : i32
    %9 = tpu.dynamic_rotate %0 by %c16_i32 dim 1 : vector<8x512xf32>, i32 -> vector<8x512xf32>
    %c1 = arith.constant 1 : index
    %c0_6 = arith.constant 0 : index
    %10 = vector.load %arg6[%c1, %c0_6] : memref<9x512xf32, #tpu.memory_space<vmem>>, vector<1x512xf32>
    %11 = vector.broadcast %10 : vector<1x512xf32> to vector<8x512xf32>
    %12 = arith.mulf %9, %11 : vector<8x512xf32>
    %c1_7 = arith.constant 1 : index
    %c0_8 = arith.constant 0 : index
    %c0_9 = arith.constant 0 : index
    %13 = vector.load %arg2[%c1_7, %c0_8, %c0_9] : memref<9x8x8xbf16, #tpu.memory_space<vmem>>, vector<1x8x8xbf16>
    %14 = vector.shape_cast %13 : vector<1x8x8xbf16> to vector<8x8xbf16>
    %15 = arith.truncf %12 : vector<8x512xf32> to vector<8x512xbf16>
    %cst_10 = arith.constant dense<0.000000e+00> : vector<8x512xf32>
    %16 = tpu.matmul %14, %15, %cst_10 {dimension_numbers = #tpu.dot_dimension_numbers<[1], [0], [0], [1], [0, 0, 1, 1], [], []>} : vector<8x8xbf16>, vector<8x512xbf16>, vector<8x512xf32> -> vector<8x512xf32>
    %17 = arith.addf %8, %16 : vector<8x512xf32>
    %c15_i32 = arith.constant 15 : i32
    %18 = tpu.dynamic_rotate %0 by %c15_i32 dim 1 : vector<8x512xf32>, i32 -> vector<8x512xf32>
    %c2 = arith.constant 2 : index
    %c0_11 = arith.constant 0 : index
    %19 = vector.load %arg6[%c2, %c0_11] : memref<9x512xf32, #tpu.memory_space<vmem>>, vector<1x512xf32>
    %20 = vector.broadcast %19 : vector<1x512xf32> to vector<8x512xf32>
    %21 = arith.mulf %18, %20 : vector<8x512xf32>
    %c2_12 = arith.constant 2 : index
    %c0_13 = arith.constant 0 : index
    %c0_14 = arith.constant 0 : index
    %22 = vector.load %arg2[%c2_12, %c0_13, %c0_14] : memref<9x8x8xbf16, #tpu.memory_space<vmem>>, vector<1x8x8xbf16>
    %23 = vector.shape_cast %22 : vector<1x8x8xbf16> to vector<8x8xbf16>
    %24 = arith.truncf %21 : vector<8x512xf32> to vector<8x512xbf16>
    %cst_15 = arith.constant dense<0.000000e+00> : vector<8x512xf32>
    %25 = tpu.matmul %23, %24, %cst_15 {dimension_numbers = #tpu.dot_dimension_numbers<[1], [0], [0], [1], [0, 0, 1, 1], [], []>} : vector<8x8xbf16>, vector<8x512xbf16>, vector<8x512xf32> -> vector<8x512xf32>
    %26 = arith.addf %17, %25 : vector<8x512xf32>
    %c1_i32 = arith.constant 1 : i32
    %27 = tpu.dynamic_rotate %0 by %c1_i32 dim 1 : vector<8x512xf32>, i32 -> vector<8x512xf32>
    %c3 = arith.constant 3 : index
    %c0_16 = arith.constant 0 : index
    %28 = vector.load %arg6[%c3, %c0_16] : memref<9x512xf32, #tpu.memory_space<vmem>>, vector<1x512xf32>
    %29 = vector.broadcast %28 : vector<1x512xf32> to vector<8x512xf32>
    %30 = arith.mulf %27, %29 : vector<8x512xf32>
    %c3_17 = arith.constant 3 : index
    %c0_18 = arith.constant 0 : index
    %c0_19 = arith.constant 0 : index
    %31 = vector.load %arg2[%c3_17, %c0_18, %c0_19] : memref<9x8x8xbf16, #tpu.memory_space<vmem>>, vector<1x8x8xbf16>
    %32 = vector.shape_cast %31 : vector<1x8x8xbf16> to vector<8x8xbf16>
    %33 = arith.truncf %30 : vector<8x512xf32> to vector<8x512xbf16>
    %cst_20 = arith.constant dense<0.000000e+00> : vector<8x512xf32>
    %34 = tpu.matmul %32, %33, %cst_20 {dimension_numbers = #tpu.dot_dimension_numbers<[1], [0], [0], [1], [0, 0, 1, 1], [], []>} : vector<8x8xbf16>, vector<8x512xbf16>, vector<8x512xf32> -> vector<8x512xf32>
    %35 = arith.addf %26, %34 : vector<8x512xf32>
    %c4 = arith.constant 4 : index
    %c0_21 = arith.constant 0 : index
    %c0_22 = arith.constant 0 : index
    %36 = vector.load %arg2[%c4, %c0_21, %c0_22] : memref<9x8x8xbf16, #tpu.memory_space<vmem>>, vector<1x8x8xbf16>
    %37 = vector.shape_cast %36 : vector<1x8x8xbf16> to vector<8x8xbf16>
    %38 = arith.truncf %0 : vector<8x512xf32> to vector<8x512xbf16>
    %cst_23 = arith.constant dense<0.000000e+00> : vector<8x512xf32>
    %39 = tpu.matmul %37, %38, %cst_23 {dimension_numbers = #tpu.dot_dimension_numbers<[1], [0], [0], [1], [0, 0, 1, 1], [], []>} : vector<8x8xbf16>, vector<8x512xbf16>, vector<8x512xf32> -> vector<8x512xf32>
    %40 = arith.addf %35, %39 : vector<8x512xf32>
    %c511_i32 = arith.constant 511 : i32
    %41 = tpu.dynamic_rotate %0 by %c511_i32 dim 1 : vector<8x512xf32>, i32 -> vector<8x512xf32>
    %c5 = arith.constant 5 : index
    %c0_24 = arith.constant 0 : index
    %42 = vector.load %arg6[%c5, %c0_24] : memref<9x512xf32, #tpu.memory_space<vmem>>, vector<1x512xf32>
    %43 = vector.broadcast %42 : vector<1x512xf32> to vector<8x512xf32>
    %44 = arith.mulf %41, %43 : vector<8x512xf32>
    %c5_25 = arith.constant 5 : index
    %c0_26 = arith.constant 0 : index
    %c0_27 = arith.constant 0 : index
    %45 = vector.load %arg2[%c5_25, %c0_26, %c0_27] : memref<9x8x8xbf16, #tpu.memory_space<vmem>>, vector<1x8x8xbf16>
    %46 = vector.shape_cast %45 : vector<1x8x8xbf16> to vector<8x8xbf16>
    %47 = arith.truncf %44 : vector<8x512xf32> to vector<8x512xbf16>
    %cst_28 = arith.constant dense<0.000000e+00> : vector<8x512xf32>
    %48 = tpu.matmul %46, %47, %cst_28 {dimension_numbers = #tpu.dot_dimension_numbers<[1], [0], [0], [1], [0, 0, 1, 1], [], []>} : vector<8x8xbf16>, vector<8x512xbf16>, vector<8x512xf32> -> vector<8x512xf32>
    %49 = arith.addf %40, %48 : vector<8x512xf32>
    %c497_i32 = arith.constant 497 : i32
    %50 = tpu.dynamic_rotate %0 by %c497_i32 dim 1 : vector<8x512xf32>, i32 -> vector<8x512xf32>
    %c6 = arith.constant 6 : index
    %c0_29 = arith.constant 0 : index
    %51 = vector.load %arg6[%c6, %c0_29] : memref<9x512xf32, #tpu.memory_space<vmem>>, vector<1x512xf32>
    %52 = vector.broadcast %51 : vector<1x512xf32> to vector<8x512xf32>
    %53 = arith.mulf %50, %52 : vector<8x512xf32>
    %c6_30 = arith.constant 6 : index
    %c0_31 = arith.constant 0 : index
    %c0_32 = arith.constant 0 : index
    %54 = vector.load %arg2[%c6_30, %c0_31, %c0_32] : memref<9x8x8xbf16, #tpu.memory_space<vmem>>, vector<1x8x8xbf16>
    %55 = vector.shape_cast %54 : vector<1x8x8xbf16> to vector<8x8xbf16>
    %56 = arith.truncf %53 : vector<8x512xf32> to vector<8x512xbf16>
    %cst_33 = arith.constant dense<0.000000e+00> : vector<8x512xf32>
    %57 = tpu.matmul %55, %56, %cst_33 {dimension_numbers = #tpu.dot_dimension_numbers<[1], [0], [0], [1], [0, 0, 1, 1], [], []>} : vector<8x8xbf16>, vector<8x512xbf16>, vector<8x512xf32> -> vector<8x512xf32>
    %58 = arith.addf %49, %57 : vector<8x512xf32>
    %c496_i32 = arith.constant 496 : i32
    %59 = tpu.dynamic_rotate %0 by %c496_i32 dim 1 : vector<8x512xf32>, i32 -> vector<8x512xf32>
    %c7 = arith.constant 7 : index
    %c0_34 = arith.constant 0 : index
    %60 = vector.load %arg6[%c7, %c0_34] : memref<9x512xf32, #tpu.memory_space<vmem>>, vector<1x512xf32>
    %61 = vector.broadcast %60 : vector<1x512xf32> to vector<8x512xf32>
    %62 = arith.mulf %59, %61 : vector<8x512xf32>
    %c7_35 = arith.constant 7 : index
    %c0_36 = arith.constant 0 : index
    %c0_37 = arith.constant 0 : index
    %63 = vector.load %arg2[%c7_35, %c0_36, %c0_37] : memref<9x8x8xbf16, #tpu.memory_space<vmem>>, vector<1x8x8xbf16>
    %64 = vector.shape_cast %63 : vector<1x8x8xbf16> to vector<8x8xbf16>
    %65 = arith.truncf %62 : vector<8x512xf32> to vector<8x512xbf16>
    %cst_38 = arith.constant dense<0.000000e+00> : vector<8x512xf32>
    %66 = tpu.matmul %64, %65, %cst_38 {dimension_numbers = #tpu.dot_dimension_numbers<[1], [0], [0], [1], [0, 0, 1, 1], [], []>} : vector<8x8xbf16>, vector<8x512xbf16>, vector<8x512xf32> -> vector<8x512xf32>
    %67 = arith.addf %58, %66 : vector<8x512xf32>
    %c495_i32 = arith.constant 495 : i32
    %68 = tpu.dynamic_rotate %0 by %c495_i32 dim 1 : vector<8x512xf32>, i32 -> vector<8x512xf32>
    %c8 = arith.constant 8 : index
    %c0_39 = arith.constant 0 : index
    %69 = vector.load %arg6[%c8, %c0_39] : memref<9x512xf32, #tpu.memory_space<vmem>>, vector<1x512xf32>
    %70 = vector.broadcast %69 : vector<1x512xf32> to vector<8x512xf32>
    %71 = arith.mulf %68, %70 : vector<8x512xf32>
    %c8_40 = arith.constant 8 : index
    %c0_41 = arith.constant 0 : index
    %c0_42 = arith.constant 0 : index
    %72 = vector.load %arg2[%c8_40, %c0_41, %c0_42] : memref<9x8x8xbf16, #tpu.memory_space<vmem>>, vector<1x8x8xbf16>
    %73 = vector.shape_cast %72 : vector<1x8x8xbf16> to vector<8x8xbf16>
    %74 = arith.truncf %71 : vector<8x512xf32> to vector<8x512xbf16>
    %cst_43 = arith.constant dense<0.000000e+00> : vector<8x512xf32>
    %75 = tpu.matmul %73, %74, %cst_43 {dimension_numbers = #tpu.dot_dimension_numbers<[1], [0], [0], [1], [0, 0, 1, 1], [], []>} : vector<8x8xbf16>, vector<8x512xbf16>, vector<8x512xf32> -> vector<8x512xf32>
    %76 = arith.addf %67, %75 : vector<8x512xf32>
    %c0_44 = arith.constant 0 : index
    %c0_45 = arith.constant 0 : index
    %77 = vector.load %arg3[%c0_44, %c0_45] : memref<8x1xf32, #tpu.memory_space<vmem>>, vector<8x1xf32>
    %78 = vector.broadcast %77 : vector<8x1xf32> to vector<8x512xf32>
    %79 = arith.addf %76, %78 : vector<8x512xf32>
    %cst_46 = arith.constant 0.000000e+00 : f32
    %80 = vector.broadcast %cst_46 : f32 to vector<8x512xf32>
    %81 = arith.maximumf %79, %80 : vector<8x512xf32>
    %c17_i32_47 = arith.constant 17 : i32
    %82 = tpu.dynamic_rotate %81 by %c17_i32_47 dim 1 : vector<8x512xf32>, i32 -> vector<8x512xf32>
    %c0_48 = arith.constant 0 : index
    %c0_49 = arith.constant 0 : index
    %83 = vector.load %arg6[%c0_48, %c0_49] : memref<9x512xf32, #tpu.memory_space<vmem>>, vector<1x512xf32>
    %84 = vector.broadcast %83 : vector<1x512xf32> to vector<8x512xf32>
    %85 = arith.mulf %82, %84 : vector<8x512xf32>
    %c0_50 = arith.constant 0 : index
    %c0_51 = arith.constant 0 : index
    %c0_52 = arith.constant 0 : index
    %86 = vector.load %arg4[%c0_50, %c0_51, %c0_52] : memref<9x8x8xbf16, #tpu.memory_space<vmem>>, vector<1x8x8xbf16>
    %87 = vector.shape_cast %86 : vector<1x8x8xbf16> to vector<8x8xbf16>
    %88 = arith.truncf %85 : vector<8x512xf32> to vector<8x512xbf16>
    %cst_53 = arith.constant dense<0.000000e+00> : vector<8x512xf32>
    %89 = tpu.matmul %87, %88, %cst_53 {dimension_numbers = #tpu.dot_dimension_numbers<[1], [0], [0], [1], [0, 0, 1, 1], [], []>} : vector<8x8xbf16>, vector<8x512xbf16>, vector<8x512xf32> -> vector<8x512xf32>
    %c16_i32_54 = arith.constant 16 : i32
    %90 = tpu.dynamic_rotate %81 by %c16_i32_54 dim 1 : vector<8x512xf32>, i32 -> vector<8x512xf32>
    %c1_55 = arith.constant 1 : index
    %c0_56 = arith.constant 0 : index
    %91 = vector.load %arg6[%c1_55, %c0_56] : memref<9x512xf32, #tpu.memory_space<vmem>>, vector<1x512xf32>
    %92 = vector.broadcast %91 : vector<1x512xf32> to vector<8x512xf32>
    %93 = arith.mulf %90, %92 : vector<8x512xf32>
    %c1_57 = arith.constant 1 : index
    %c0_58 = arith.constant 0 : index
    %c0_59 = arith.constant 0 : index
    %94 = vector.load %arg4[%c1_57, %c0_58, %c0_59] : memref<9x8x8xbf16, #tpu.memory_space<vmem>>, vector<1x8x8xbf16>
    %95 = vector.shape_cast %94 : vector<1x8x8xbf16> to vector<8x8xbf16>
    %96 = arith.truncf %93 : vector<8x512xf32> to vector<8x512xbf16>
    %cst_60 = arith.constant dense<0.000000e+00> : vector<8x512xf32>
    %97 = tpu.matmul %95, %96, %cst_60 {dimension_numbers = #tpu.dot_dimension_numbers<[1], [0], [0], [1], [0, 0, 1, 1], [], []>} : vector<8x8xbf16>, vector<8x512xbf16>, vector<8x512xf32> -> vector<8x512xf32>
    %98 = arith.addf %89, %97 : vector<8x512xf32>
    %c15_i32_61 = arith.constant 15 : i32
    %99 = tpu.dynamic_rotate %81 by %c15_i32_61 dim 1 : vector<8x512xf32>, i32 -> vector<8x512xf32>
    %c2_62 = arith.constant 2 : index
    %c0_63 = arith.constant 0 : index
    %100 = vector.load %arg6[%c2_62, %c0_63] : memref<9x512xf32, #tpu.memory_space<vmem>>, vector<1x512xf32>
    %101 = vector.broadcast %100 : vector<1x512xf32> to vector<8x512xf32>
    %102 = arith.mulf %99, %101 : vector<8x512xf32>
    %c2_64 = arith.constant 2 : index
    %c0_65 = arith.constant 0 : index
    %c0_66 = arith.constant 0 : index
    %103 = vector.load %arg4[%c2_64, %c0_65, %c0_66] : memref<9x8x8xbf16, #tpu.memory_space<vmem>>, vector<1x8x8xbf16>
    %104 = vector.shape_cast %103 : vector<1x8x8xbf16> to vector<8x8xbf16>
    %105 = arith.truncf %102 : vector<8x512xf32> to vector<8x512xbf16>
    %cst_67 = arith.constant dense<0.000000e+00> : vector<8x512xf32>
    %106 = tpu.matmul %104, %105, %cst_67 {dimension_numbers = #tpu.dot_dimension_numbers<[1], [0], [0], [1], [0, 0, 1, 1], [], []>} : vector<8x8xbf16>, vector<8x512xbf16>, vector<8x512xf32> -> vector<8x512xf32>
    %107 = arith.addf %98, %106 : vector<8x512xf32>
    %c1_i32_68 = arith.constant 1 : i32
    %108 = tpu.dynamic_rotate %81 by %c1_i32_68 dim 1 : vector<8x512xf32>, i32 -> vector<8x512xf32>
    %c3_69 = arith.constant 3 : index
    %c0_70 = arith.constant 0 : index
    %109 = vector.load %arg6[%c3_69, %c0_70] : memref<9x512xf32, #tpu.memory_space<vmem>>, vector<1x512xf32>
    %110 = vector.broadcast %109 : vector<1x512xf32> to vector<8x512xf32>
    %111 = arith.mulf %108, %110 : vector<8x512xf32>
    %c3_71 = arith.constant 3 : index
    %c0_72 = arith.constant 0 : index
    %c0_73 = arith.constant 0 : index
    %112 = vector.load %arg4[%c3_71, %c0_72, %c0_73] : memref<9x8x8xbf16, #tpu.memory_space<vmem>>, vector<1x8x8xbf16>
    %113 = vector.shape_cast %112 : vector<1x8x8xbf16> to vector<8x8xbf16>
    %114 = arith.truncf %111 : vector<8x512xf32> to vector<8x512xbf16>
    %cst_74 = arith.constant dense<0.000000e+00> : vector<8x512xf32>
    %115 = tpu.matmul %113, %114, %cst_74 {dimension_numbers = #tpu.dot_dimension_numbers<[1], [0], [0], [1], [0, 0, 1, 1], [], []>} : vector<8x8xbf16>, vector<8x512xbf16>, vector<8x512xf32> -> vector<8x512xf32>
    %116 = arith.addf %107, %115 : vector<8x512xf32>
    %c4_75 = arith.constant 4 : index
    %c0_76 = arith.constant 0 : index
    %c0_77 = arith.constant 0 : index
    %117 = vector.load %arg4[%c4_75, %c0_76, %c0_77] : memref<9x8x8xbf16, #tpu.memory_space<vmem>>, vector<1x8x8xbf16>
    %118 = vector.shape_cast %117 : vector<1x8x8xbf16> to vector<8x8xbf16>
    %119 = arith.truncf %81 : vector<8x512xf32> to vector<8x512xbf16>
    %cst_78 = arith.constant dense<0.000000e+00> : vector<8x512xf32>
    %120 = tpu.matmul %118, %119, %cst_78 {dimension_numbers = #tpu.dot_dimension_numbers<[1], [0], [0], [1], [0, 0, 1, 1], [], []>} : vector<8x8xbf16>, vector<8x512xbf16>, vector<8x512xf32> -> vector<8x512xf32>
    %121 = arith.addf %116, %120 : vector<8x512xf32>
    %c511_i32_79 = arith.constant 511 : i32
    %122 = tpu.dynamic_rotate %81 by %c511_i32_79 dim 1 : vector<8x512xf32>, i32 -> vector<8x512xf32>
    %c5_80 = arith.constant 5 : index
    %c0_81 = arith.constant 0 : index
    %123 = vector.load %arg6[%c5_80, %c0_81] : memref<9x512xf32, #tpu.memory_space<vmem>>, vector<1x512xf32>
    %124 = vector.broadcast %123 : vector<1x512xf32> to vector<8x512xf32>
    %125 = arith.mulf %122, %124 : vector<8x512xf32>
    %c5_82 = arith.constant 5 : index
    %c0_83 = arith.constant 0 : index
    %c0_84 = arith.constant 0 : index
    %126 = vector.load %arg4[%c5_82, %c0_83, %c0_84] : memref<9x8x8xbf16, #tpu.memory_space<vmem>>, vector<1x8x8xbf16>
    %127 = vector.shape_cast %126 : vector<1x8x8xbf16> to vector<8x8xbf16>
    %128 = arith.truncf %125 : vector<8x512xf32> to vector<8x512xbf16>
    %cst_85 = arith.constant dense<0.000000e+00> : vector<8x512xf32>
    %129 = tpu.matmul %127, %128, %cst_85 {dimension_numbers = #tpu.dot_dimension_numbers<[1], [0], [0], [1], [0, 0, 1, 1], [], []>} : vector<8x8xbf16>, vector<8x512xbf16>, vector<8x512xf32> -> vector<8x512xf32>
    %130 = arith.addf %121, %129 : vector<8x512xf32>
    %c497_i32_86 = arith.constant 497 : i32
    %131 = tpu.dynamic_rotate %81 by %c497_i32_86 dim 1 : vector<8x512xf32>, i32 -> vector<8x512xf32>
    %c6_87 = arith.constant 6 : index
    %c0_88 = arith.constant 0 : index
    %132 = vector.load %arg6[%c6_87, %c0_88] : memref<9x512xf32, #tpu.memory_space<vmem>>, vector<1x512xf32>
    %133 = vector.broadcast %132 : vector<1x512xf32> to vector<8x512xf32>
    %134 = arith.mulf %131, %133 : vector<8x512xf32>
    %c6_89 = arith.constant 6 : index
    %c0_90 = arith.constant 0 : index
    %c0_91 = arith.constant 0 : index
    %135 = vector.load %arg4[%c6_89, %c0_90, %c0_91] : memref<9x8x8xbf16, #tpu.memory_space<vmem>>, vector<1x8x8xbf16>
    %136 = vector.shape_cast %135 : vector<1x8x8xbf16> to vector<8x8xbf16>
    %137 = arith.truncf %134 : vector<8x512xf32> to vector<8x512xbf16>
    %cst_92 = arith.constant dense<0.000000e+00> : vector<8x512xf32>
    %138 = tpu.matmul %136, %137, %cst_92 {dimension_numbers = #tpu.dot_dimension_numbers<[1], [0], [0], [1], [0, 0, 1, 1], [], []>} : vector<8x8xbf16>, vector<8x512xbf16>, vector<8x512xf32> -> vector<8x512xf32>
    %139 = arith.addf %130, %138 : vector<8x512xf32>
    %c496_i32_93 = arith.constant 496 : i32
    %140 = tpu.dynamic_rotate %81 by %c496_i32_93 dim 1 : vector<8x512xf32>, i32 -> vector<8x512xf32>
    %c7_94 = arith.constant 7 : index
    %c0_95 = arith.constant 0 : index
    %141 = vector.load %arg6[%c7_94, %c0_95] : memref<9x512xf32, #tpu.memory_space<vmem>>, vector<1x512xf32>
    %142 = vector.broadcast %141 : vector<1x512xf32> to vector<8x512xf32>
    %143 = arith.mulf %140, %142 : vector<8x512xf32>
    %c7_96 = arith.constant 7 : index
    %c0_97 = arith.constant 0 : index
    %c0_98 = arith.constant 0 : index
    %144 = vector.load %arg4[%c7_96, %c0_97, %c0_98] : memref<9x8x8xbf16, #tpu.memory_space<vmem>>, vector<1x8x8xbf16>
    %145 = vector.shape_cast %144 : vector<1x8x8xbf16> to vector<8x8xbf16>
    %146 = arith.truncf %143 : vector<8x512xf32> to vector<8x512xbf16>
    %cst_99 = arith.constant dense<0.000000e+00> : vector<8x512xf32>
    %147 = tpu.matmul %145, %146, %cst_99 {dimension_numbers = #tpu.dot_dimension_numbers<[1], [0], [0], [1], [0, 0, 1, 1], [], []>} : vector<8x8xbf16>, vector<8x512xbf16>, vector<8x512xf32> -> vector<8x512xf32>
    %148 = arith.addf %139, %147 : vector<8x512xf32>
    %c495_i32_100 = arith.constant 495 : i32
    %149 = tpu.dynamic_rotate %81 by %c495_i32_100 dim 1 : vector<8x512xf32>, i32 -> vector<8x512xf32>
    %c8_101 = arith.constant 8 : index
    %c0_102 = arith.constant 0 : index
    %150 = vector.load %arg6[%c8_101, %c0_102] : memref<9x512xf32, #tpu.memory_space<vmem>>, vector<1x512xf32>
    %151 = vector.broadcast %150 : vector<1x512xf32> to vector<8x512xf32>
    %152 = arith.mulf %149, %151 : vector<8x512xf32>
    %c8_103 = arith.constant 8 : index
    %c0_104 = arith.constant 0 : index
    %c0_105 = arith.constant 0 : index
    %153 = vector.load %arg4[%c8_103, %c0_104, %c0_105] : memref<9x8x8xbf16, #tpu.memory_space<vmem>>, vector<1x8x8xbf16>
    %154 = vector.shape_cast %153 : vector<1x8x8xbf16> to vector<8x8xbf16>
    %155 = arith.truncf %152 : vector<8x512xf32> to vector<8x512xbf16>
    %cst_106 = arith.constant dense<0.000000e+00> : vector<8x512xf32>
    %156 = tpu.matmul %154, %155, %cst_106 {dimension_numbers = #tpu.dot_dimension_numbers<[1], [0], [0], [1], [0, 0, 1, 1], [], []>} : vector<8x8xbf16>, vector<8x512xbf16>, vector<8x512xf32> -> vector<8x512xf32>
    %157 = arith.addf %148, %156 : vector<8x512xf32>
    %c0_107 = arith.constant 0 : index
    %c0_108 = arith.constant 0 : index
    %158 = vector.load %arg5[%c0_107, %c0_108] : memref<8x1xf32, #tpu.memory_space<vmem>>, vector<8x1xf32>
    %159 = vector.broadcast %158 : vector<8x1xf32> to vector<8x512xf32>
    %160 = arith.addf %157, %159 : vector<8x512xf32>
    %cst_109 = arith.constant 0.000000e+00 : f32
    %161 = vector.broadcast %cst_109 : f32 to vector<8x512xf32>
    %162 = arith.maximumf %160, %161 : vector<8x512xf32>
    %c0_110 = arith.constant 0 : index
    %c0_111 = arith.constant 0 : index
    %163 = vector.load %arg7[%c0_110, %c0_111] : memref<8x512xf32, #tpu.memory_space<vmem>>, vector<8x512xf32>
    tpu.vector_store %arg7[%c0_110, %c0_111], %162 {strides = array<i32>} : memref<8x512xf32, #tpu.memory_space<vmem>>, vector<8x512xf32>,
    return
  }
  func.func @transform_0(%arg0: i32) -> (i32, i32) {
    %c0_i32 = arith.constant 0 : i32
    %c0_i32_0 = arith.constant 0 : i32
    %c0_i32_1 = arith.constant 0 : i32
    return %c0_i32, %c0_i32_0 : i32, i32
  }
  func.func @transform_1(%arg0: i32) -> (i32, i32, i32) {
    %c0_i32 = arith.constant 0 : i32
    %c0_i32_0 = arith.constant 0 : i32
    %c0_i32_1 = arith.constant 0 : i32
    %c0_i32_2 = arith.constant 0 : i32
    return %c0_i32, %c0_i32_0, %c0_i32_1 : i32, i32, i32
  }
  func.func @transform_2(%arg0: i32) -> (i32, i32) {
    %c0_i32 = arith.constant 0 : i32
    %c0_i32_0 = arith.constant 0 : i32
    %c0_i32_1 = arith.constant 0 : i32
    return %c0_i32, %c0_i32_0 : i32, i32
  }
  func.func @transform_3(%arg0: i32) -> (i32, i32, i32) {
    %c0_i32 = arith.constant 0 : i32
    %c0_i32_0 = arith.constant 0 : i32
    %c0_i32_1 = arith.constant 0 : i32
    %c0_i32_2 = arith.constant 0 : i32
    return %c0_i32, %c0_i32_0, %c0_i32_1 : i32, i32, i32
  }
  func.func @transform_4(%arg0: i32) -> (i32, i32) {
    %c0_i32 = arith.constant 0 : i32
    %c0_i32_0 = arith.constant 0 : i32
    %c0_i32_1 = arith.constant 0 : i32
    return %c0_i32, %c0_i32_0 : i32, i32
  }
  func.func @transform_5(%arg0: i32) -> (i32, i32) {
    %c0_i32 = arith.constant 0 : i32
    %c0_i32_0 = arith.constant 0 : i32
    %c0_i32_1 = arith.constant 0 : i32
    return %c0_i32, %c0_i32_0 : i32, i32
  }
  func.func @transform_6(%arg0: i32) -> (i32, i32) {
    %c0_i32 = arith.constant 0 : i32
    %c0_i32_0 = arith.constant 0 : i32
    %c0_i32_1 = arith.constant 0 : i32
    return %c0_i32, %c0_i32_0 : i32, i32
  }
}

</mosaic_0001>

<bundles_post_ra>
// kernel: tpu_custom_call.1
= control target key start
LH: loop header
LB: loop body
LE: loop exit
PB: predicated region body
PF: predicated region fallthrough
CT: control target
= control target key end

     0   :  { %6 = vsyncpa [#allocation3], 0  ;;  %s128_s0 = inlined_call_operand.hbm [shape: s32[8,128], index: 0, kind: input, shape index: {}]   ;;  %s129_s1 = inlined_call_operand.hbm [shape: s32[8,128], index: 1, kind: output, shape index: {}]  }
   0x1   :  { %7 = vsyncpa [#allocation4], 0  ;;  %s91_s6 = smov [#allocation2]   ;;  %s43_s10 = scalar_lea.hbm %s128_s0, 128 }
   0x2   :  { %s14_s7 = sshll.u32 %s91_s6, 4  ;;  %p44_p0 = scmp.ne.s32.totalorder %s128_s0, %s43_s10  ;;  %s15_s7 = int_to_ptr.vmem [resolvable:$true] %s14_s7 }
   0x3   :  { %p47_p1 = scmp.lt.u32.totalorder %s43_s10, %s128_s0 }
   0x5   :  { %p49_p2 = pnand %p47_p1, %p44_p0 }
   0x7   :  { %52 = shalt.err (!%p49_p2)
}
   0x8   :  { %s53_s15 = scalar_lea.vmem %s15_s7, 128  ;;  %p58_p4 = scmp.lt.s32.totalorder %s15_s7, %s15_s7 }
   0x9   :  { %p54_p3 = scmp.ne.s32.totalorder %s15_s7, %s53_s15  ;;  %p59_p5 = scmp.lt.s32.totalorder %s53_s15, %s53_s15 }
   0xb   :  { %p60_p6 = por %p59_p5, %p58_p4 }
   0xd   :  { %p61_p7 = pnand %p60_p6, %p54_p3 }
   0xf   :  { %64 = shalt.err (!%p61_p7)
}
  0x10   :  { %17 = dma.hbm_to_vmem [thread:$0]  %s128_s0, 128, %s15_s7, [#allocation3]  }
  0x11   :  { %87 = dma.done.wait [#allocation3], 128  }
  0x12   :  { %88 = vsyncadd [#allocation3], 4294967168  ;;  %v21_v0 = vld [vmem:[#allocation2] sm:$0xff]  ;;  %s92_s18 = smov 1   ;;  %s93_s19 = smov [#allocation5]  }
  0x13   :  { %22 = vrot.lane.b32.xlu0 %v21_v0, %s92_s18  ;;  %s31_s20 = sshll.u32 %s93_s19, 4  ;;  %s32_s20 = int_to_ptr.vmem [resolvable:$true] %s31_s20 }
  0x14   :  { %s65_s21 = scalar_lea.vmem %s32_s20, 128  ;;  %p70_p9 = scmp.lt.s32.totalorder %s32_s20, %s32_s20 }
  0x15   :  { %p66_p8 = scmp.ne.s32.totalorder %s32_s20, %s65_s21  ;;  %p71_p10 = scmp.lt.s32.totalorder %s65_s21, %s65_s21 }
  0x17   :  { %p72_p11 = por %p71_p10, %p70_p9 }
  0x19   :  { %p73_p12 = pnand %p72_p11, %p66_p8 }
  0x85   :  { %v23_v1 = vpop.permute.xlu0 %22 }
  0x86   :  { %24 = vst [vmem:[#allocation5] sm:$0xff] %v23_v1 }
  0x87   :  { %76 = shalt.err (!%p73_p12)
}
  0x88   :  { %s77_s0 = scalar_lea.hbm %s129_s1, 128 }
  0x89   :  { %p78_p13 = scmp.ne.s32.totalorder %s129_s1, %s77_s0  ;;  %p81_p0 = scmp.lt.u32.totalorder %s77_s0, %s129_s1 }
  0x8b   :  { %p83_p1 = pnand %p81_p0, %p78_p13 }
  0x8d   :  { %86 = shalt.err (!%p83_p1)
}
  0x8e   :  { %34 = dma.vmem_to_hbm [thread:$0]  %s32_s20, 128, %s129_s1, [#allocation4]  }
  0x8f   :  { %89 = dma.done.wait [#allocation4], 128  }
  0x90   :  { %90 = vsyncadd [#allocation4], 4294967168 }
  0x91   :  { %38 = vsyncpa [#allocation3], 1 }
  0x92   :  { %39 = vsyncpa [#allocation4], 1 }

// kernel: _block_forward_impl.1
= control target key start
LH: loop header
LB: loop body
LE: loop exit
PB: predicated region body
PF: predicated region fallthrough
CT: control target
= control target key end

     0   :  { %v2528_v2 = vmov 0   ;;  %s2529_s25 = smov 16   ;;  %s2530_s30 = smov 17   ;;  %v36_v6 = vlaneseq  ;;  %vm124_vm2 = vcmask 1043456   ;;  %vm120_vm3 = vcmask 64512   ;;  %s3291_s0 = inlined_call_operand.vmem [shape: f32[8,512], index: 0, kind: input, shape index: {}]   ;;  %s3292_s2 = inlined_call_operand.vmem [shape: f32[8,1], index: 2, kind: input, shape index: {}]   ;;  %s3293_s5 = inlined_call_operand.vmem [shape: f32[9,512], index: 5, kind: input, shape index: {}]   ;;  %s3294_s1 = inlined_call_operand.vmem [shape: bf16[9,8,8], index: 1, kind: input, shape index: {}]   ;;  %s3295_s4 = inlined_call_operand.vmem [shape: f32[8,1], index: 4, kind: input, shape index: {}]   ;;  %s3296_s3 = inlined_call_operand.vmem [shape: bf16[9,8,8], index: 3, kind: input, shape index: {}]   ;;  %s3297_s6 = inlined_call_operand.vmem [shape: f32[8,512], index: 6, kind: output, shape index: {}]  }
   0x1   :  { %v2575_v0 = vld [vmem:[%s3291_s0 + $0x10] sm:$0xff]  ;;  %v2580_v1 = vld [vmem:[%s3291_s0] sm:$0xff]  ;;  %169 = vmatprep.mubr.bf16.mxu0 %v2528_v2  ;;  %210 = vmatprep.mubr.bf16.mxu1 %v2528_v2  ;;  %v2591_v3 = vld [vmem:[%s3291_s0 + $0x18] sm:$0xff]  ;;  %s2532_s7 = smov 1   ;;  %s2533_s8 = smov 127  }
   0x2   :  { %78 = vrot.lane.b32.xlu1 %v2575_v0, %s2529_s25  ;;  %74 = vrot.lane.b32.xlu0 %v2580_v1, %s2529_s25  ;;  %v2596_v4 = vld [vmem:[%s3291_s0 + $0x8] sm:$0xff]  ;;  %s2531_s0 = smov 15   ;;  %s2534_s9 = smov 113   ;;  %v1305_v5 = vld [vmem:[%s3292_s2] sm:$0xff]  ;;  %v46_v7 = vshrl.u32 %v36_v6, 7  ;;  %v2662_v8 = vand.u32 127, %v36_v6 }
   0x3   :  { %2527 = vset.pattern.permute.xlu0 %v2528_v2  ;;  %s2535_s10 = smov 112   ;;  %s2536_s11 = smov 111   ;;  %v2423_v13 = vld [vmem:[%s3293_s5 + $0x1] ss:$8 sm:$0xf] }
   0x4   :  { %v2664_v9 = vsub.s32 0, %v46_v7  ;;  %v2666_v10 = vsub.s32 2, %v46_v7  ;;  %v2668_v11 = vsub.s32 1, %v46_v7  ;;  %v2670_v12 = vsub.s32 3, %v46_v7  ;;  %v2424_v46 = vld [vmem:[%s3294_s1 + $0x4] sm:$0xf] }
   0x5   :  { %vm82_vm0 = vcmp.lt.s32.totalorder %v2662_v8, 16  ;;  %v43_v16 = vld [vmem:[%s3293_s5] ss:$8 sm:$0xf]  ;;  %vm38_vm1 = vcmp.lt.s32.totalorder %v2662_v8, 17  ;;  %vm324_vm4 = vcmp.lt.s32.totalorder %v2662_v8, 15 }
   0x6   :  { %80 = vrot.lane.b32.xlu1 %v2591_v3, %s2529_s25  ;;  %76 = vrot.lane.b32.xlu0 %v2596_v4, %s2529_s25  ;;  %v2680_v17 = vrot.slane %v2423_v13, %v2664_v9  ;;  %v2683_v18 = vrot.slane %v2423_v13, %v2666_v10  ;;  %v2686_v19 = vrot.slane %v2423_v13, %v2668_v11  ;;  %v2433_v45 = vld [vmem:[%s3293_s5 + $0x2] ss:$8 sm:$0xf]  ;;  %vm471_vm5 = vcmp.lt.s32.totalorder %v2662_v8, 1 }
   0x7   :  { %v2689_v20 = vrot.slane %v2423_v13, %v2670_v12  ;;  %v2693_v23 = vrot.slane %v43_v16, %v2668_v11  ;;  %v2710_v39 = vrot.slane %v43_v16, %v2664_v9  ;;  %v2713_v40 = vrot.slane %v43_v16, %v2666_v10 }
   0x8   :  { %v2721_v44 = vrot.slane %v43_v16, %v2670_v12  ;;  %v2736_v53 = vrot.slane %v2433_v45, %v2668_v11  ;;  %v2750_v63 = vrot.slane %v2433_v45, %v2664_v9  ;;  %v69_v16 = vld [vmem:[%s3294_s1] sm:$0xf]  ;;  %vm725_vm6 = vcmp.lt.s32.totalorder %v2662_v8, 127 }
   0x9   :  { %vm872_vm7 = vcmp.lt.s32.totalorder %v2662_v8, 113  ;;  %vm1019_vm8 = vcmp.lt.s32.totalorder %v2662_v8, 112  ;;  %vm1166_vm9 = vcmp.lt.s32.totalorder %v2662_v8, 111 }
   0xa   :  { %30 = vrot.lane.b32.xlu1 %v2596_v4, %s2530_s30  ;;  %28 = vrot.lane.b32.xlu0 %v2580_v1, %s2530_s30 }
   0xe   :  { %34 = vrot.lane.b32.xlu1 %v2591_v3, %s2530_s30  ;;  %32 = vrot.lane.b32.xlu0 %v2575_v0, %s2530_s30 }
  0x12   :  { %318 = vrot.lane.b32.xlu1 %v2596_v4, %s2531_s0  ;;  %316 = vrot.lane.b32.xlu0 %v2580_v1, %s2531_s0 }
  0x16   :  { %322 = vrot.lane.b32.xlu1 %v2591_v3, %s2531_s0  ;;  %320 = vrot.lane.b32.xlu0 %v2575_v0, %s2531_s0 }
  0x1a   :  { %465 = vrot.lane.b32.xlu1 %v2596_v4, %s2532_s7  ;;  %463 = vrot.lane.b32.xlu0 %v2580_v1, %s2532_s7 }
  0x1e   :  { %469 = vrot.lane.b32.xlu1 %v2591_v3, %s2532_s7  ;;  %467 = vrot.lane.b32.xlu0 %v2575_v0, %s2532_s7 }
  0x22   :  { %719 = vrot.lane.b32.xlu1 %v2596_v4, %s2533_s8  ;;  %717 = vrot.lane.b32.xlu0 %v2580_v1, %s2533_s8 }
  0x26   :  { %723 = vrot.lane.b32.xlu1 %v2591_v3, %s2533_s8  ;;  %721 = vrot.lane.b32.xlu0 %v2575_v0, %s2533_s8 }
  0x2a   :  { %866 = vrot.lane.b32.xlu1 %v2596_v4, %s2534_s9  ;;  %864 = vrot.lane.b32.xlu0 %v2580_v1, %s2534_s9 }
  0x2e   :  { %870 = vrot.lane.b32.xlu1 %v2591_v3, %s2534_s9  ;;  %868 = vrot.lane.b32.xlu0 %v2575_v0, %s2534_s9 }
  0x32   :  { %1013 = vrot.lane.b32.xlu1 %v2596_v4, %s2535_s10  ;;  %1011 = vrot.lane.b32.xlu0 %v2580_v1, %s2535_s10 }
  0x36   :  { %1017 = vrot.lane.b32.xlu1 %v2591_v3, %s2535_s10  ;;  %1015 = vrot.lane.b32.xlu0 %v2575_v0, %s2535_s10 }
  0x3a   :  { %1160 = vrot.lane.b32.xlu1 %v2596_v4, %s2536_s11  ;;  %1158 = vrot.lane.b32.xlu0 %v2580_v1, %s2536_s11 }
  0x3e   :  { %1164 = vrot.lane.b32.xlu1 %v2591_v3, %s2536_s11  ;;  %1162 = vrot.lane.b32.xlu0 %v2575_v0, %s2536_s11 }
  0x42   :  { %1308 = vperm.xlu0 %2527, %v1305_v5   ;;  %v2753_v5 = vrot.slane %v2433_v45, %v2666_v10 }
  0x74   :  { %v79_v14 = vpop.permute.xlu1 %78  ;;  %v75_v15 = vpop.permute.xlu0 %74 }
  0x78   :  { %v81_v21 = vpop.permute.xlu1 %80  ;;  %v77_v22 = vpop.permute.xlu0 %76 }
  0x79   :  { %v83_v24 = vsel %vm82_vm0, %v79_v14, %v81_v21  ;;  %v86_v25 = vsel %vm82_vm0, %v81_v21, %v75_v15  ;;  %v84_v26 = vsel %vm82_vm0, %v77_v22, %v79_v14  ;;  %v85_v27 = vsel %vm82_vm0, %v75_v15, %v77_v22  ;;  %v2439_v15 = vld [vmem:[%s3293_s5 + $0x3] ss:$8 sm:$0xf] }
  0x7a   :  { %v110_v28 = vmul.f32 %v2680_v17, %v86_v25  ;;  %v112_v29 = vmul.f32 %v2683_v18, %v84_v26  ;;  %v111_v30 = vmul.f32 %v2686_v19, %v85_v27  ;;  %v113_v31 = vmul.f32 %v2689_v20, %v83_v24 }
  0x7b   :  { %v2760_v14 = vrot.slane %v2433_v45, %v2670_v12 }
  0x7c   :  { %v31_v32 = vpop.permute.xlu1 %30  ;;  %v29_v33 = vpop.permute.xlu0 %28  ;;  %v117_v34 = vpack.c.bf16 %v111_v30, %v111_v30  ;;  %v119_v35 = vpack.c.bf16 %v113_v31, %v113_v31  ;;  %v116_v36 = vpack.c.bf16 %v110_v28, %v110_v28  ;;  %v118_v37 = vpack.c.bf16 %v112_v29, %v112_v29 }
  0x7d   :  { %v41_v38 = vsel %vm38_vm1, %v29_v33, %v31_v32  ;;  %v2775_v28 = vrot.slane %v2439_v15, %v2668_v11 }
  0x7e   :  { %v66_v41 = vmul.f32 %v2693_v23, %v41_v38  ;;  %2425 = vmatprep.subr.msk.bf16.mxu0 %vm124_vm2, %v117_v34  ;;  %2427 = vmatprep.subr.msk.bf16.mxu1 %vm124_vm2, %v119_v35  ;;  %v126_v42 = vsel %vm124_vm2, %v116_v36, 0  ;;  %v132_v43 = vsel %vm124_vm2, %v118_v37, 0  ;;  %v2789_v38 = vrot.slane %v2439_v15, %v2664_v9 }
  0x7f   :  { %138 = vmatpush1.bf16.msra.mxu0 %v126_v42  ;;  %179 = vmatpush1.bf16.msra.mxu1 %v132_v43 }
  0x80   :  { %v71_v47 = vpack.c.bf16 %v66_v41, %v66_v41  ;;  %v35_v48 = vpop.permute.xlu1 %34  ;;  %v33_v49 = vpop.permute.xlu0 %32  ;;  %v2792_v41 = vrot.slane %v2439_v15, %v2666_v10 }
  0x81   :  { %v42_v50 = vsel %vm38_vm1, %v35_v48, %v29_v33  ;;  %v39_v51 = vsel %vm38_vm1, %v33_v49, %v35_v48  ;;  %v40_v52 = vsel %vm38_vm1, %v31_v32, %v33_v49  ;;  %v2434_v48 = vld [vmem:[%s3294_s1 + $0x8] sm:$0xf] }
  0x82   :  { %v65_v54 = vmul.f32 %v2710_v39, %v42_v50  ;;  %v67_v55 = vmul.f32 %v2713_v40, %v40_v52  ;;  %v68_v56 = vmul.f32 %v2721_v44, %v39_v51  ;;  %2426 = vmatmul.mubr.msk.bf16.vlgmr.msra.gmra.mrb[0].mxu0 %vm120_vm3, %v2424_v46  ;;  %2428 = vmatmul.mubr.msk.bf16.vlgmr.msra.gmra.mrb[0].mxu1 %vm120_vm3, %v2424_v46 }
  0x83   :  { %2429 = vmatprep.subr.msk.bf16.mxu0 %vm124_vm2, %v71_v47  ;;  %266 = vmatprep.mubr.bf16.mxu0 %v2528_v2  ;;  %v2799_v46 = vrot.slane %v2439_v15, %v2670_v12  ;;  %v2450_v47 = vld [vmem:[%s3293_s5 + $0x5] ss:$8 sm:$0xf] }
  0x84   :  { %v70_v57 = vpack.c.bf16 %v65_v54, %v65_v54  ;;  %v72_v58 = vpack.c.bf16 %v67_v55, %v67_v55  ;;  %v73_v59 = vpack.c.bf16 %v68_v56, %v68_v56  ;;  %v319_v60 = vpop.permute.xlu1 %318  ;;  %v317_v61 = vpop.permute.xlu0 %316  ;;  %307 = vmatprep.mubr.bf16.mxu1 %v2528_v2  ;;  %v2814_v56 = vrot.slane %v2450_v47, %v2664_v9 }
  0x85   :  { %v327_v62 = vsel %vm324_vm4, %v317_v61, %v319_v60 }
  0x86   :  { %v353_v6 = vmul.f32 %v2736_v53, %v327_v62  ;;  %2431 = vmatprep.subr.msk.bf16.mxu1 %vm124_vm2, %v73_v59  ;;  %v223_v7 = vsel %vm124_vm2, %v70_v57, 0  ;;  %v229_v13 = vsel %vm124_vm2, %v72_v58, 0  ;;  %v612_v62 = vpack.c.bf16 %v2580_v1, %v2580_v1 }
  0x87   :  { %235 = vmatpush1.bf16.msra.mxu0 %v223_v7  ;;  %276 = vmatpush1.bf16.msra.mxu1 %v229_v13 }
  0x88   :  { %v359_v21 = vpack.c.bf16 %v353_v6, %v353_v6  ;;  %v323_v22 = vpop.permute.xlu1 %322  ;;  %v321_v24 = vpop.permute.xlu0 %320 }
  0x89   :  { %v328_v25 = vsel %vm324_vm4, %v323_v22, %v317_v61  ;;  %v325_v26 = vsel %vm324_vm4, %v321_v24, %v323_v22  ;;  %v326_v27 = vsel %vm324_vm4, %v319_v60, %v321_v24  ;;  %v613_v60 = vpack.c.bf16 %v2596_v4, %v2596_v4 }
  0x8a   :  { %v352_v29 = vmul.f32 %v2750_v63, %v328_v25  ;;  %v354_v30 = vmul.f32 %v2753_v5, %v326_v27  ;;  %v355_v31 = vmul.f32 %v2760_v14, %v325_v26  ;;  %2430 = vmatmul.mubr.msk.bf16.vlgmr.msra.gmra.mrb[4].mxu0 %vm120_vm3, %v69_v16  ;;  %2432 = vmatmul.mubr.msk.bf16.vlgmr.msra.gmra.mrb[4].mxu1 %vm120_vm3, %v69_v16  ;;  %v2440_v26 = vld [vmem:[%s3294_s1 + $0xc] sm:$0xf] }
  0x8b   :  { %2435 = vmatprep.subr.msk.bf16.mxu0 %vm124_vm2, %v359_v21  ;;  %409 = vmatprep.mubr.bf16.mxu0 %v2528_v2  ;;  %v615_v61 = vpack.c.bf16 %v2591_v3, %v2591_v3  ;;  %v614_v21 = vpack.c.bf16 %v2575_v0, %v2575_v0  ;;  %v2836_v4 = vrot.slane %v2450_v47, %v2670_v12 }
  0x8c   :  { %v358_v32 = vpack.c.bf16 %v352_v29, %v352_v29  ;;  %v360_v33 = vpack.c.bf16 %v354_v30, %v354_v30  ;;  %v361_v34 = vpack.c.bf16 %v355_v31, %v355_v31  ;;  %v466_v35 = vpop.permute.xlu1 %465  ;;  %v464_v36 = vpop.permute.xlu0 %463  ;;  %450 = vmatprep.mubr.bf16.mxu1 %v2528_v2  ;;  %v2842_v24 = vrot.slane %v2450_v47, %v2668_v11 }
  0x8d   :  { %v474_v37 = vsel %vm471_vm5, %v464_v36, %v466_v35  ;;  %v2845_v25 = vrot.slane %v2450_v47, %v2666_v10  ;;  %v620_v30 = vsel %vm124_vm2, %v612_v62, 0  ;;  %v626_v31 = vsel %vm124_vm2, %v614_v21, 0 }
  0x8e   :  { %v500_v42 = vmul.f32 %v2775_v28, %v474_v37  ;;  %2437 = vmatprep.subr.msk.bf16.mxu1 %vm124_vm2, %v361_v34  ;;  %v366_v43 = vsel %vm124_vm2, %v358_v32, 0  ;;  %v372_v45 = vsel %vm124_vm2, %v360_v33, 0  ;;  %v2456_v32 = vld [vmem:[%s3293_s5 + $0x6] ss:$8 sm:$0xf] }
  0x8f   :  { %378 = vmatpush1.bf16.msra.mxu0 %v366_v43  ;;  %419 = vmatpush1.bf16.msra.mxu1 %v372_v45  ;;  %v2871_v45 = vrot.slane %v2456_v32, %v2664_v9 }
  0x90   :  { %v506_v49 = vpack.c.bf16 %v500_v42, %v500_v42  ;;  %v470_v50 = vpop.permute.xlu1 %469  ;;  %v468_v51 = vpop.permute.xlu0 %467 }
  0x91   :  { %v475_v52 = vsel %vm471_vm5, %v470_v50, %v464_v36  ;;  %v472_v54 = vsel %vm471_vm5, %v468_v51, %v470_v50  ;;  %v473_v55 = vsel %vm471_vm5, %v466_v35, %v468_v51 }
  0x92   :  { %v499_v57 = vmul.f32 %v2789_v38, %v475_v52  ;;  %v501_v58 = vmul.f32 %v2792_v41, %v473_v55  ;;  %v502_v59 = vmul.f32 %v2799_v46, %v472_v54  ;;  %2436 = vmatmul.mubr.msk.bf16.vlgmr.msra.gmra.mrb[8].mxu0 %vm120_vm3, %v2434_v48  ;;  %2438 = vmatmul.mubr.msk.bf16.vlgmr.msra.gmra.mrb[8].mxu1 %vm120_vm3, %v2434_v48 }
  0x93   :  { %2441 = vmatprep.subr.msk.bf16.mxu0 %vm124_vm2, %v506_v49  ;;  %556 = vmatprep.mubr.bf16.mxu0 %v2528_v2  ;;  %v2880_v54 = vrot.slane %v2456_v32, %v2670_v12  ;;  %v2883_v55 = vrot.slane %v2456_v32, %v2668_v11 }
  0x94   :  { %v505_v6 = vpack.c.bf16 %v499_v57, %v499_v57  ;;  %v507_v7 = vpack.c.bf16 %v501_v58, %v501_v58  ;;  %v508_v13 = vpack.c.bf16 %v502_v59, %v502_v59  ;;  %v720_v15 = vpop.permute.xlu1 %719  ;;  %v718_v16 = vpop.permute.xlu0 %717  ;;  %597 = vmatprep.mubr.bf16.mxu1 %v2528_v2  ;;  %v2886_v57 = vrot.slane %v2456_v32, %v2666_v10  ;;  %v2445_v59 = vld [vmem:[%s3294_s1 + $0x10] sm:$0xf] }
  0x95   :  { %v728_v22 = vsel %vm725_vm6, %v718_v16, %v720_v15 }
  0x96   :  { %2443 = vmatprep.subr.msk.bf16.mxu1 %vm124_vm2, %v508_v13  ;;  %v513_v1 = vsel %vm124_vm2, %v505_v6, 0  ;;  %v519_v3 = vsel %vm124_vm2, %v507_v7, 0  ;;  %v753_v0 = vmul.f32 %v2814_v56, %v728_v22  ;;  %v2462_v7 = vld [vmem:[%s3293_s5 + $0x7] ss:$8 sm:$0xf] }
  0x97   :  { %525 = vmatpush1.bf16.msra.mxu0 %v513_v1  ;;  %566 = vmatpush1.bf16.msra.mxu1 %v519_v3 }
  0x98   :  { %v724_v27 = vpop.permute.xlu1 %723  ;;  %v722_v29 = vpop.permute.xlu0 %721  ;;  %2446 = vmatprep.subr.msk.bf16.mxu0 %vm124_vm2, %v613_v60  ;;  %2448 = vmatprep.subr.msk.bf16.mxu1 %vm124_vm2, %v615_v61  ;;  %v759_v43 = vpack.c.bf16 %v753_v0, %v753_v0  ;;  %v2910_v0 = vrot.slane %v2462_v7, %v2664_v9 }
  0x99   :  { %v729_v33 = vsel %vm725_vm6, %v724_v27, %v718_v16  ;;  %v726_v34 = vsel %vm725_vm6, %v722_v29, %v724_v27  ;;  %v727_v35 = vsel %vm725_vm6, %v720_v15, %v722_v29 }
  0x9a   :  { %2442 = vmatmul.mubr.msk.bf16.vlgmr.msra.gmra.mrb[12].mxu0 %vm120_vm3, %v2440_v26  ;;  %2444 = vmatmul.mubr.msk.bf16.vlgmr.msra.gmra.mrb[12].mxu1 %vm120_vm3, %v2440_v26  ;;  %v756_v36 = vmul.f32 %v2836_v4, %v729_v33  ;;  %v754_v37 = vmul.f32 %v2842_v24, %v727_v35  ;;  %v755_v42 = vmul.f32 %v2845_v25, %v726_v34  ;;  %v767_v60 = vsel %vm124_vm2, %v759_v43, 0 }
  0x9b   :  { %632 = vmatpush1.bf16.msra.mxu0 %v620_v30  ;;  %673 = vmatpush1.bf16.msra.mxu1 %v626_v31  ;;  %v2919_v33 = vrot.slane %v2462_v7, %v2670_v12  ;;  %v2922_v34 = vrot.slane %v2462_v7, %v2668_v11  ;;  %v2925_v35 = vrot.slane %v2462_v7, %v2666_v10 }
  0x9c   :  { %v762_v47 = vpack.c.bf16 %v756_v36, %v756_v36  ;;  %v760_v48 = vpack.c.bf16 %v754_v37, %v754_v37  ;;  %v761_v49 = vpack.c.bf16 %v755_v42, %v755_v42  ;;  %v867_v50 = vpop.permute.xlu1 %866  ;;  %v865_v51 = vpop.permute.xlu0 %864  ;;  %663 = vmatprep.mubr.bf16.mxu0 %v2528_v2  ;;  %704 = vmatprep.mubr.bf16.mxu1 %v2528_v2  ;;  %v2451_v37 = vld [vmem:[%s3294_s1 + $0x14] sm:$0xf] }
  0x9d   :  { %v875_v52 = vsel %vm872_vm7, %v865_v51, %v867_v50 }
  0x9e   :  { %2452 = vmatprep.subr.msk.bf16.mxu0 %vm124_vm2, %v760_v48  ;;  %2454 = vmatprep.subr.msk.bf16.mxu1 %vm124_vm2, %v762_v47  ;;  %v900_v58 = vmul.f32 %v2871_v45, %v875_v52  ;;  %v773_v6 = vsel %vm124_vm2, %v761_v49, 0  ;;  %v2468_v49 = vld [vmem:[%s3293_s5 + $0x20] ss:$8 sm:$0xf] }
  0xa0   :  { %v871_v61 = vpop.permute.xlu1 %870  ;;  %v869_v62 = vpop.permute.xlu0 %868  ;;  %v906_v3 = vpack.c.bf16 %v900_v58, %v900_v58 }
  0xa1   :  { %v876_v13 = vsel %vm872_vm7, %v871_v61, %v865_v51  ;;  %v873_v15 = vsel %vm872_vm7, %v869_v62, %v871_v61  ;;  %v874_v16 = vsel %vm872_vm7, %v867_v50, %v869_v62  ;;  %v2949_v62 = vrot.slane %v2468_v49, %v2664_v9 }
  0xa2   :  { %2447 = vmatmul.mubr.msk.bf16.vlgmr.msra.gmra.mrb[16].mxu0 %vm120_vm3, %v2445_v59  ;;  %2449 = vmatmul.mubr.msk.bf16.vlgmr.msra.gmra.mrb[16].mxu1 %vm120_vm3, %v2445_v59  ;;  %v903_v21 = vmul.f32 %v2880_v54, %v876_v13  ;;  %v901_v22 = vmul.f32 %v2883_v55, %v874_v16  ;;  %v902_v1 = vmul.f32 %v2886_v57, %v873_v15  ;;  %v914_v42 = vsel %vm124_vm2, %v906_v3, 0 }
  0xa3   :  { %779 = vmatpush1.bf16.msra.mxu0 %v767_v60  ;;  %820 = vmatpush1.bf16.msra.mxu1 %v773_v6  ;;  %v2961_v9 = vrot.slane %v2468_v49, %v2668_v11 }
  0xa4   :  { %v909_v26 = vpack.c.bf16 %v903_v21, %v903_v21  ;;  %v907_v27 = vpack.c.bf16 %v901_v22, %v901_v22  ;;  %v908_v29 = vpack.c.bf16 %v902_v1, %v902_v1  ;;  %v1014_v30 = vpop.permute.xlu1 %1013  ;;  %v1012_v31 = vpop.permute.xlu0 %1011  ;;  %810 = vmatprep.mubr.bf16.mxu0 %v2528_v2  ;;  %851 = vmatprep.mubr.bf16.mxu1 %v2528_v2 }
  0xa5   :  { %v1022_v32 = vsel %vm1019_vm8, %v1012_v31, %v1014_v30  ;;  %v2958_v22 = vrot.slane %v2468_v49, %v2670_v12  ;;  %v2964_v1 = vrot.slane %v2468_v49, %v2666_v10  ;;  %v2463_v49 = vld [vmem:[%s3294_s1 + $0x1c] sm:$0xf] }
  0xa6   :  { %2458 = vmatprep.subr.msk.bf16.mxu0 %vm124_vm2, %v907_v27  ;;  %2460 = vmatprep.subr.msk.bf16.mxu1 %vm124_vm2, %v909_v26  ;;  %v1047_v36 = vmul.f32 %v2910_v0, %v1022_v32  ;;  %v920_v48 = vsel %vm124_vm2, %v908_v29, 0  ;;  %v2457_v26 = vld [vmem:[%s3294_s1 + $0x18] sm:$0xf] }
  0xa8   :  { %v1018_v43 = vpop.permute.xlu1 %1017  ;;  %v1016_v47 = vpop.permute.xlu0 %1015  ;;  %v1053_v61 = vpack.c.bf16 %v1047_v36, %v1047_v36 }
  0xa9   :  { %v1023_v50 = vsel %vm1019_vm8, %v1018_v43, %v1012_v31  ;;  %v1020_v51 = vsel %vm1019_vm8, %v1016_v47, %v1018_v43  ;;  %v1021_v52 = vsel %vm1019_vm8, %v1014_v30, %v1016_v47 }
  0xaa   :  { %2453 = vmatmul.mubr.msk.bf16.vlgmr.msra.gmra.mrb[20].mxu0 %vm120_vm3, %v2451_v37  ;;  %2455 = vmatmul.mubr.msk.bf16.vlgmr.msra.gmra.mrb[20].mxu1 %vm120_vm3, %v2451_v37  ;;  %v1050_v58 = vmul.f32 %v2919_v33, %v1023_v50  ;;  %v1048_v59 = vmul.f32 %v2922_v34, %v1021_v52  ;;  %v1049_v60 = vmul.f32 %v2925_v35, %v1020_v51  ;;  %v1061_v27 = vsel %vm124_vm2, %v1053_v61, 0  ;;  %v2469_v52 = vld [vmem:[%s3294_s1 + $0x20] sm:$0xf] }
  0xab   :  { %926 = vmatpush1.bf16.msra.mxu0 %v914_v42  ;;  %967 = vmatpush1.bf16.msra.mxu1 %v920_v48 }
  0xac   :  { %v1056_v6 = vpack.c.bf16 %v1050_v58, %v1050_v58  ;;  %v1054_v7 = vpack.c.bf16 %v1048_v59, %v1048_v59  ;;  %v1055_v13 = vpack.c.bf16 %v1049_v60, %v1049_v60  ;;  %v1161_v15 = vpop.permute.xlu1 %1160  ;;  %v1159_v16 = vpop.permute.xlu0 %1158  ;;  %957 = vmatprep.mubr.bf16.mxu0 %v2528_v2  ;;  %998 = vmatprep.mubr.bf16.mxu1 %v2528_v2 }
  0xad   :  { %v1169_v21 = vsel %vm1166_vm9, %v1159_v16, %v1161_v15 }
  0xae   :  { %2464 = vmatprep.subr.msk.bf16.mxu0 %vm124_vm2, %v1054_v7  ;;  %2466 = vmatprep.subr.msk.bf16.mxu1 %vm124_vm2, %v1056_v6  ;;  %v1194_v3 = vmul.f32 %v2949_v62, %v1169_v21  ;;  %v1067_v31 = vsel %vm124_vm2, %v1055_v13, 0 }
  0xb0   :  { %v1165_v29 = vpop.permute.xlu1 %1164  ;;  %v1163_v30 = vpop.permute.xlu0 %1162  ;;  %v1200_v42 = vpack.c.bf16 %v1194_v3, %v1194_v3 }
  0xb1   :  { %v1170_v12 = vsel %vm1166_vm9, %v1165_v29, %v1159_v16  ;;  %v1167_v11 = vsel %vm1166_vm9, %v1163_v30, %v1165_v29  ;;  %v1168_v10 = vsel %vm1166_vm9, %v1161_v15, %v1163_v30 }
  0xb2   :  { %2459 = vmatmul.mubr.msk.bf16.vlgmr.msra.gmra.mrb[24].mxu0 %vm120_vm3, %v2457_v26  ;;  %2461 = vmatmul.mubr.msk.bf16.vlgmr.msra.gmra.mrb[24].mxu1 %vm120_vm3, %v2457_v26  ;;  %v1197_v32 = vmul.f32 %v2958_v22, %v1170_v12  ;;  %v1195_v36 = vmul.f32 %v2961_v9, %v1168_v10  ;;  %v1196_v37 = vmul.f32 %v2964_v1, %v1167_v11  ;;  %v1208_v50 = vsel %vm124_vm2, %v1200_v42, 0 }
  0xb3   :  { %1073 = vmatpush1.bf16.msra.mxu0 %v1061_v27  ;;  %1114 = vmatpush1.bf16.msra.mxu1 %v1067_v31 }
  0xb4   :  { %v1203_v43 = vpack.c.bf16 %v1197_v32, %v1197_v32  ;;  %v1201_v47 = vpack.c.bf16 %v1195_v36, %v1195_v36  ;;  %v1202_v48 = vpack.c.bf16 %v1196_v37, %v1196_v37  ;;  %1104 = vmatprep.mubr.bf16.mxu0 %v2528_v2  ;;  %1145 = vmatprep.mubr.bf16.mxu1 %v2528_v2 }
  0xb6   :  { %2470 = vmatprep.subr.msk.bf16.mxu0 %vm124_vm2, %v1201_v47  ;;  %2472 = vmatprep.subr.msk.bf16.mxu1 %vm124_vm2, %v1203_v43  ;;  %v1214_v51 = vsel %vm124_vm2, %v1202_v48, 0 }
  0xba   :  { %2465 = vmatmul.mubr.msk.bf16.vlgmr.msra.gmra.mrb[28].mxu0 %vm120_vm3, %v2463_v49  ;;  %2467 = vmatmul.mubr.msk.bf16.vlgmr.msra.gmra.mrb[28].mxu1 %vm120_vm3, %v2463_v49 }
  0xbb   :  { %1220 = vmatpush1.bf16.msra.mxu0 %v1208_v50  ;;  %1261 = vmatpush1.bf16.msra.mxu1 %v1214_v51 }
  0xbc   :  { %1251 = vmatprep.mubr.bf16.mxu0 %v2528_v2  ;;  %1292 = vmatprep.mubr.bf16.mxu1 %v2528_v2 }
  0xc2   :  { %2471 = vmatmul.mubr.msk.bf16.vlgmr.msra.gmra.mrb[32].mxu0 %vm120_vm3, %v2469_v52  ;;  %2473 = vmatmul.mubr.msk.bf16.vlgmr.msra.gmra.mrb[32].mxu1 %vm120_vm3, %v2469_v52 }
  0xc3   :  { %1409 = vmatprep.mubr.bf16.mxu0 %v2528_v2  ;;  %1450 = vmatprep.mubr.bf16.mxu1 %v2528_v2 }
 0x155   :  { %v171_v58 = vpop.f32.mrb[0].mxu0  ;;  %v212_v59 = vpop.f32.mrb[0].mxu1 }
 0x156   :  { %v173_v60 = vpop.f32.mrb[1].mxu0  ;;  %v214_v61 = vpop.f32.mrb[1].mxu1 }
 0x157   :  { %v175_v6 = vpop.f32.mrb[2].mxu0  ;;  %v216_v7 = vpop.f32.mrb[2].mxu1 }
 0x158   :  { %v176_v13 = vpop.f32.mrb[3].mxu0  ;;  %v217_v15 = vpop.f32.mrb[3].mxu1 }
 0x15d   :  { %v268_v16 = vpop.f32.mrb[4].mxu0  ;;  %v309_v21 = vpop.f32.mrb[4].mxu1 }
 0x15e   :  { %v269_v3 = vadd.f32 %v268_v16, %v171_v58  ;;  %v310_v26 = vadd.f32 %v309_v21, %v212_v59  ;;  %v270_v27 = vpop.f32.mrb[5].mxu0  ;;  %v311_v29 = vpop.f32.mrb[5].mxu1 }
 0x15f   :  { %v271_v30 = vadd.f32 %v270_v27, %v173_v60  ;;  %v312_v31 = vadd.f32 %v311_v29, %v214_v61  ;;  %v272_v12 = vpop.f32.mrb[6].mxu0  ;;  %v313_v11 = vpop.f32.mrb[6].mxu1 }
 0x160   :  { %v273_v10 = vpop.f32.mrb[7].mxu0  ;;  %v314_v32 = vpop.f32.mrb[7].mxu1 }
 0x165   :  { %v411_v36 = vpop.f32.mrb[8].mxu0  ;;  %v452_v37 = vpop.f32.mrb[8].mxu1 }
 0x166   :  { %v459_v42 = vadd.f32 %v411_v36, %v269_v3  ;;  %v461_v43 = vadd.f32 %v452_v37, %v310_v26  ;;  %v413_v47 = vpop.f32.mrb[9].mxu0  ;;  %v454_v48 = vpop.f32.mrb[9].mxu1 }
 0x167   :  { %v460_v49 = vadd.f32 %v413_v47, %v271_v30  ;;  %v462_v50 = vadd.f32 %v454_v48, %v312_v31  ;;  %v415_v51 = vpop.f32.mrb[10].mxu0  ;;  %v456_v52 = vpop.f32.mrb[10].mxu1 }
 0x168   :  { %v416_v58 = vpop.f32.mrb[11].mxu0  ;;  %v457_v59 = vpop.f32.mrb[11].mxu1 }
 0x16d   :  { %v558_v6 = vpop.f32.mrb[12].mxu0  ;;  %v599_v7 = vpop.f32.mrb[12].mxu1 }
 0x16e   :  { %v606_v60 = vadd.f32 %v558_v6, %v459_v42  ;;  %v608_v61 = vadd.f32 %v599_v7, %v461_v43  ;;  %v560_v13 = vpop.f32.mrb[13].mxu0  ;;  %v601_v15 = vpop.f32.mrb[13].mxu1 }
 0x16f   :  { %v607_v16 = vadd.f32 %v560_v13, %v460_v49  ;;  %v609_v21 = vadd.f32 %v601_v15, %v462_v50  ;;  %v562_v27 = vpop.f32.mrb[14].mxu0  ;;  %v603_v29 = vpop.f32.mrb[14].mxu1 }
 0x170   :  { %v563_v3 = vpop.f32.mrb[15].mxu0  ;;  %v604_v26 = vpop.f32.mrb[15].mxu1 }
 0x175   :  { %v665_v12 = vpop.f32.mrb[16].mxu0  ;;  %v706_v11 = vpop.f32.mrb[16].mxu1 }
 0x176   :  { %v713_v30 = vadd.f32 %v665_v12, %v606_v60  ;;  %v715_v31 = vadd.f32 %v706_v11, %v608_v61  ;;  %v667_v10 = vpop.f32.mrb[17].mxu0  ;;  %v708_v32 = vpop.f32.mrb[17].mxu1 }
 0x177   :  { %v714_v36 = vadd.f32 %v667_v10, %v607_v16  ;;  %v716_v37 = vadd.f32 %v708_v32, %v609_v21  ;;  %v669_v47 = vpop.f32.mrb[18].mxu0  ;;  %v710_v48 = vpop.f32.mrb[18].mxu1 }
 0x178   :  { %v670_v42 = vpop.f32.mrb[19].mxu0  ;;  %v711_v43 = vpop.f32.mrb[19].mxu1 }
 0x17d   :  { %v812_v51 = vpop.f32.mrb[20].mxu0  ;;  %v853_v52 = vpop.f32.mrb[20].mxu1 }
 0x17e   :  { %v860_v49 = vadd.f32 %v812_v51, %v713_v30  ;;  %v862_v50 = vadd.f32 %v853_v52, %v715_v31  ;;  %v814_v58 = vpop.f32.mrb[21].mxu0  ;;  %v855_v59 = vpop.f32.mrb[21].mxu1 }
 0x17f   :  { %v861_v6 = vadd.f32 %v814_v58, %v714_v36  ;;  %v863_v7 = vadd.f32 %v855_v59, %v716_v37  ;;  %v816_v13 = vpop.f32.mrb[22].mxu0  ;;  %v857_v15 = vpop.f32.mrb[22].mxu1 }
 0x180   :  { %v817_v60 = vpop.f32.mrb[23].mxu0  ;;  %v858_v61 = vpop.f32.mrb[23].mxu1 }
 0x181   :  { %v1309_v13 = vpop.permute.xlu0 %1308 }
 0x185   :  { %v959_v27 = vpop.f32.mrb[24].mxu0  ;;  %v1000_v29 = vpop.f32.mrb[24].mxu1 }
 0x186   :  { %v1007_v16 = vadd.f32 %v959_v27, %v860_v49  ;;  %v1009_v21 = vadd.f32 %v1000_v29, %v862_v50  ;;  %v961_v3 = vpop.f32.mrb[25].mxu0  ;;  %v1002_v26 = vpop.f32.mrb[25].mxu1 }
 0x187   :  { %v1008_v12 = vadd.f32 %v961_v3, %v861_v6  ;;  %v1010_v11 = vadd.f32 %v1002_v26, %v863_v7  ;;  %v963_v10 = vpop.f32.mrb[26].mxu0  ;;  %v1004_v32 = vpop.f32.mrb[26].mxu1 }
 0x188   :  { %v964_v30 = vpop.f32.mrb[27].mxu0  ;;  %v1005_v31 = vpop.f32.mrb[27].mxu1 }
 0x18d   :  { %v1106_v47 = vpop.f32.mrb[28].mxu0  ;;  %v1147_v48 = vpop.f32.mrb[28].mxu1 }
 0x18e   :  { %v1154_v36 = vadd.f32 %v1106_v47, %v1007_v16  ;;  %v1156_v37 = vadd.f32 %v1147_v48, %v1009_v21  ;;  %v1108_v42 = vpop.f32.mrb[29].mxu0  ;;  %v1149_v43 = vpop.f32.mrb[29].mxu1 }
 0x18f   :  { %v1155_v51 = vadd.f32 %v1108_v42, %v1008_v12  ;;  %v1157_v52 = vadd.f32 %v1149_v43, %v1010_v11  ;;  %v1110_v58 = vpop.f32.mrb[30].mxu0  ;;  %v1151_v59 = vpop.f32.mrb[30].mxu1 }
 0x190   :  { %v1111_v49 = vpop.f32.mrb[31].mxu0  ;;  %v1152_v50 = vpop.f32.mrb[31].mxu1 }
 0x195   :  { %v1253_v15 = vpop.f32.mrb[32].mxu0  ;;  %v1294_v6 = vpop.f32.mrb[32].mxu1 }
 0x196   :  { %v1301_v7 = vadd.f32 %v1253_v15, %v1154_v36  ;;  %v1303_v60 = vadd.f32 %v1294_v6, %v1156_v37  ;;  %v1255_v61 = vpop.f32.mrb[33].mxu0  ;;  %v1296_v27 = vpop.f32.mrb[33].mxu1  ;;  %v2401_v37 = vld [vmem:[%s3295_s4] sm:$0xff] }
 0x197   :  { %v1302_v29 = vadd.f32 %v1255_v61, %v1155_v51  ;;  %v1304_v3 = vadd.f32 %v1296_v27, %v1157_v52  ;;  %v1257_v26 = vpop.f32.mrb[34].mxu0  ;;  %v1298_v16 = vpop.f32.mrb[34].mxu1 }
 0x198   :  { %v1311_v21 = vadd.f32 %v1309_v13, %v1301_v7  ;;  %v1313_v10 = vadd.f32 %v1309_v13, %v1303_v60  ;;  %v1258_v32 = vpop.f32.mrb[35].mxu0  ;;  %v1299_v12 = vpop.f32.mrb[35].mxu1 }
 0x199   :  { %v1312_v11 = vadd.f32 %v1309_v13, %v1302_v29  ;;  %v1314_v47 = vadd.f32 %v1309_v13, %v1304_v3  ;;  %v2474_v12 = vld [vmem:[%s3296_s3 + $0x4] sm:$0xf] }
 0x19a   :  { %v3003_v30 = vmax.f32 %v1311_v21, 0.0  ;;  %v3005_v31 = vmax.f32 %v1313_v10, 0.0 }
 0x19b   :  { %v3011_v48 = vmax.f32 %v1312_v11, 0.0  ;;  %v3017_v36 = vmax.f32 %v1314_v47, 0.0 }
 0x19c   :  { %1344 = vrot.lane.b32.xlu0 %v3005_v31, %s2529_s25  ;;  %1340 = vrot.lane.b32.xlu1 %v3003_v30, %s2529_s25 }
 0x1a0   :  { %1319 = vrot.lane.b32.xlu0 %v3003_v30, %s2530_s30  ;;  %1342 = vrot.lane.b32.xlu1 %v3011_v48, %s2529_s25 }
 0x1a4   :  { %1323 = vrot.lane.b32.xlu0 %v3005_v31, %s2530_s30  ;;  %1346 = vrot.lane.b32.xlu1 %v3017_v36, %s2529_s25 }
 0x1a8   :  { %1556 = vrot.lane.b32.xlu0 %v3003_v30, %s2531_s0  ;;  %1321 = vrot.lane.b32.xlu1 %v3011_v48, %s2530_s30 }
 0x1ac   :  { %1560 = vrot.lane.b32.xlu0 %v3005_v31, %s2531_s0  ;;  %1325 = vrot.lane.b32.xlu1 %v3017_v36, %s2530_s30 }
 0x1b0   :  { %1679 = vrot.lane.b32.xlu0 %v3003_v30, %s2532_s7  ;;  %1558 = vrot.lane.b32.xlu1 %v3011_v48, %s2531_s0 }
 0x1b4   :  { %1683 = vrot.lane.b32.xlu0 %v3005_v31, %s2532_s7  ;;  %1562 = vrot.lane.b32.xlu1 %v3017_v36, %s2531_s0 }
 0x1b8   :  { %1909 = vrot.lane.b32.xlu0 %v3003_v30, %s2533_s8  ;;  %1681 = vrot.lane.b32.xlu1 %v3011_v48, %s2532_s7 }
 0x1bc   :  { %1913 = vrot.lane.b32.xlu0 %v3005_v31, %s2533_s8  ;;  %1685 = vrot.lane.b32.xlu1 %v3017_v36, %s2532_s7 }
 0x1c0   :  { %2032 = vrot.lane.b32.xlu0 %v3003_v30, %s2534_s9  ;;  %1911 = vrot.lane.b32.xlu1 %v3011_v48, %s2533_s8 }
 0x1c4   :  { %2036 = vrot.lane.b32.xlu0 %v3005_v31, %s2534_s9  ;;  %1915 = vrot.lane.b32.xlu1 %v3017_v36, %s2533_s8 }
 0x1c8   :  { %2155 = vrot.lane.b32.xlu0 %v3003_v30, %s2535_s10  ;;  %2034 = vrot.lane.b32.xlu1 %v3011_v48, %s2534_s9 }
 0x1cc   :  { %2159 = vrot.lane.b32.xlu0 %v3005_v31, %s2535_s10  ;;  %2038 = vrot.lane.b32.xlu1 %v3017_v36, %s2534_s9 }
 0x1d0   :  { %2278 = vrot.lane.b32.xlu0 %v3003_v30, %s2536_s11  ;;  %2157 = vrot.lane.b32.xlu1 %v3011_v48, %s2535_s10 }
 0x1d4   :  { %2282 = vrot.lane.b32.xlu0 %v3005_v31, %s2536_s11  ;;  %2161 = vrot.lane.b32.xlu1 %v3017_v36, %s2535_s10 }
 0x1d8   :  { %2404 = vperm.xlu0 %2527, %v2401_v37   ;;  %2280 = vrot.lane.b32.xlu1 %v3011_v48, %s2536_s11 }
 0x1dc   :  { %2284 = vrot.lane.b32.xlu1 %v3017_v36, %s2536_s11 }
 0x20e   :  { %v1345_v42 = vpop.permute.xlu0 %1344  ;;  %v1341_v43 = vpop.permute.xlu1 %1340 }
 0x212   :  { %v1320_v51 = vpop.permute.xlu0 %1319  ;;  %v1343_v52 = vpop.permute.xlu1 %1342 }
 0x213   :  { %v1349_v58 = vsel %vm82_vm0, %v1343_v52, %v1345_v42  ;;  %v1350_v59 = vsel %vm82_vm0, %v1341_v43, %v1343_v52 }
 0x214   :  { %v1353_v49 = vmul.f32 %v1350_v59, %v2686_v19  ;;  %v1354_v50 = vmul.f32 %v1349_v58, %v2683_v18 }
 0x216   :  { %v1359_v13 = vpack.c.bf16 %v1353_v49, %v1353_v49  ;;  %v1324_v15 = vpop.permute.xlu0 %1323  ;;  %v1347_v6 = vpop.permute.xlu1 %1346  ;;  %v1360_v61 = vpack.c.bf16 %v1354_v50, %v1354_v50 }
 0x217   :  { %v1348_v7 = vsel %vm82_vm0, %v1345_v42, %v1347_v6  ;;  %v1351_v60 = vsel %vm82_vm0, %v1347_v6, %v1341_v43 }
 0x218   :  { %v1352_v27 = vmul.f32 %v1351_v60, %v2680_v17  ;;  %v1355_v29 = vmul.f32 %v1348_v7, %v2689_v20  ;;  %2475 = vmatprep.subr.msk.bf16.mxu0 %vm124_vm2, %v1359_v13  ;;  %v1372_v20 = vsel %vm124_vm2, %v1360_v61, 0  ;;  %v1335_v7 = vld [vmem:[%s3296_s3] sm:$0xf] }
 0x21a   :  { %v1358_v3 = vpack.c.bf16 %v1352_v27, %v1352_v27  ;;  %v1361_v19 = vpack.c.bf16 %v1355_v29, %v1355_v29  ;;  %v1557_v26 = vpop.permute.xlu0 %1556  ;;  %v1322_v18 = vpop.permute.xlu1 %1321 }
 0x21b   :  { %v1328_v16 = vsel %vm38_vm1, %v1322_v18, %v1324_v15  ;;  %v1329_v21 = vsel %vm38_vm1, %v1320_v51, %v1322_v18 }
 0x21c   :  { %v1332_v10 = vmul.f32 %v1329_v21, %v2693_v23  ;;  %v1333_v32 = vmul.f32 %v1328_v16, %v2713_v40  ;;  %2477 = vmatprep.subr.msk.bf16.mxu1 %vm124_vm2, %v1361_v19  ;;  %v1366_v17 = vsel %vm124_vm2, %v1358_v3, 0 }
 0x21d   :  { %1378 = vmatpush1.bf16.msra.mxu0 %v1366_v17  ;;  %1419 = vmatpush1.bf16.msra.mxu1 %v1372_v20 }
 0x21e   :  { %v1337_v11 = vpack.c.bf16 %v1332_v10, %v1332_v10  ;;  %v1561_v47 = vpop.permute.xlu0 %1560  ;;  %v1326_v37 = vpop.permute.xlu1 %1325  ;;  %v1338_v42 = vpack.c.bf16 %v1333_v32, %v1333_v32 }
 0x21f   :  { %v1327_v23 = vsel %vm38_vm1, %v1324_v15, %v1326_v37  ;;  %v1330_v40 = vsel %vm38_vm1, %v1326_v37, %v1320_v51 }
 0x220   :  { %v1331_v43 = vmul.f32 %v1330_v40, %v2710_v39  ;;  %v1334_v52 = vmul.f32 %v1327_v23, %v2721_v44  ;;  %2476 = vmatmul.mubr.msk.bf16.vlgmr.msra.gmra.mrb[36].mxu0 %vm120_vm3, %v2474_v12  ;;  %2478 = vmatmul.mubr.msk.bf16.vlgmr.msra.gmra.mrb[36].mxu1 %vm120_vm3, %v2474_v12  ;;  %v1469_v6 = vsel %vm124_vm2, %v1338_v42, 0  ;;  %v2483_v12 = vld [vmem:[%s3296_s3 + $0x8] sm:$0xf] }
 0x221   :  { %2479 = vmatprep.subr.msk.bf16.mxu0 %vm124_vm2, %v1337_v11  ;;  %1506 = vmatprep.mubr.bf16.mxu0 %v2528_v2 }
 0x222   :  { %v1336_v58 = vpack.c.bf16 %v1331_v43, %v1331_v43  ;;  %v1339_v59 = vpack.c.bf16 %v1334_v52, %v1334_v52  ;;  %v1680_v49 = vpop.permute.xlu0 %1679  ;;  %v1559_v50 = vpop.permute.xlu1 %1558  ;;  %1547 = vmatprep.mubr.bf16.mxu1 %v2528_v2 }
 0x223   :  { %v1565_v51 = vsel %vm324_vm4, %v1559_v50, %v1561_v47  ;;  %v1566_v39 = vsel %vm324_vm4, %v1557_v26, %v1559_v50  ;;  %v1805_v50 = vpack.c.bf16 %v3011_v48, %v3011_v48  ;;  %v2488_v48 = vld [vmem:[%s3296_s3 + $0xc] sm:$0xf] }
 0x224   :  { %v1569_v44 = vmul.f32 %v1566_v39, %v2736_v53  ;;  %v1570_v13 = vmul.f32 %v1565_v51, %v2753_v5  ;;  %2481 = vmatprep.subr.msk.bf16.mxu1 %vm124_vm2, %v1339_v59  ;;  %v1463_v15 = vsel %vm124_vm2, %v1336_v58, 0  ;;  %v1806_v51 = vpack.c.bf16 %v3005_v31, %v3005_v31 }
 0x225   :  { %1475 = vmatpush1.bf16.msra.mxu0 %v1463_v15  ;;  %1516 = vmatpush1.bf16.msra.mxu1 %v1469_v6 }
 0x226   :  { %v1575_v60 = vpack.c.bf16 %v1569_v44, %v1569_v44  ;;  %v1684_v61 = vpop.permute.xlu0 %1683  ;;  %v1563_v27 = vpop.permute.xlu1 %1562  ;;  %v1576_v29 = vpack.c.bf16 %v1570_v13, %v1570_v13 }
 0x227   :  { %v1564_v53 = vsel %vm324_vm4, %v1561_v47, %v1563_v27  ;;  %v1567_v5 = vsel %vm324_vm4, %v1563_v27, %v1557_v26 }
 0x228   :  { %v1568_v3 = vmul.f32 %v1567_v5, %v2750_v63  ;;  %v1571_v19 = vmul.f32 %v1564_v53, %v2760_v14  ;;  %2480 = vmatmul.mubr.msk.bf16.vlgmr.msra.gmra.mrb[40].mxu0 %vm120_vm3, %v1335_v7  ;;  %2482 = vmatmul.mubr.msk.bf16.vlgmr.msra.gmra.mrb[40].mxu1 %vm120_vm3, %v1335_v7  ;;  %v1588_v20 = vsel %vm124_vm2, %v1576_v29, 0  ;;  %v1818_v53 = vsel %vm124_vm2, %v1806_v51, 0 }
 0x229   :  { %2484 = vmatprep.subr.msk.bf16.mxu0 %vm124_vm2, %v1575_v60  ;;  %1625 = vmatprep.mubr.bf16.mxu0 %v2528_v2 }
 0x22a   :  { %v1574_v18 = vpack.c.bf16 %v1568_v3, %v1568_v3  ;;  %v1577_v16 = vpack.c.bf16 %v1571_v19, %v1571_v19  ;;  %v1910_v21 = vpop.permute.xlu0 %1909  ;;  %v1682_v10 = vpop.permute.xlu1 %1681  ;;  %1666 = vmatprep.mubr.bf16.mxu1 %v2528_v2 }
 0x22b   :  { %v1688_v26 = vsel %vm471_vm5, %v1682_v10, %v1684_v61  ;;  %v1689_v63 = vsel %vm471_vm5, %v1680_v49, %v1682_v10 }
 0x22c   :  { %v1692_v14 = vmul.f32 %v1689_v63, %v2775_v28  ;;  %v1693_v32 = vmul.f32 %v1688_v26, %v2792_v41  ;;  %2486 = vmatprep.subr.msk.bf16.mxu1 %vm124_vm2, %v1577_v16  ;;  %v1582_v17 = vsel %vm124_vm2, %v1574_v18, 0  ;;  %v2493_v16 = vld [vmem:[%s3296_s3 + $0x10] sm:$0xf] }
 0x22d   :  { %1594 = vmatpush1.bf16.msra.mxu0 %v1582_v17  ;;  %1635 = vmatpush1.bf16.msra.mxu1 %v1588_v20 }
 0x22e   :  { %v1698_v11 = vpack.c.bf16 %v1692_v14, %v1692_v14  ;;  %v1914_v47 = vpop.permute.xlu0 %1913  ;;  %v1686_v37 = vpop.permute.xlu1 %1685  ;;  %v1699_v23 = vpack.c.bf16 %v1693_v32, %v1693_v32 }
 0x22f   :  { %v1687_v28 = vsel %vm471_vm5, %v1684_v61, %v1686_v37  ;;  %v1690_v41 = vsel %vm471_vm5, %v1686_v37, %v1680_v49  ;;  %v1804_v49 = vpack.c.bf16 %v3003_v30, %v3003_v30 }
 0x230   :  { %v1691_v40 = vmul.f32 %v1690_v41, %v2789_v38  ;;  %v1694_v42 = vmul.f32 %v1687_v28, %v2799_v46  ;;  %2485 = vmatmul.mubr.msk.bf16.vlgmr.msra.gmra.mrb[44].mxu0 %vm120_vm3, %v2483_v12  ;;  %2487 = vmatmul.mubr.msk.bf16.vlgmr.msra.gmra.mrb[44].mxu1 %vm120_vm3, %v2483_v12  ;;  %v1807_v46 = vpack.c.bf16 %v3017_v36, %v3017_v36  ;;  %v1711_v13 = vsel %vm124_vm2, %v1699_v23, 0  ;;  %v2498_v23 = vld [vmem:[%s3296_s3 + $0x14] sm:$0xf] }
 0x231   :  { %2489 = vmatprep.subr.msk.bf16.mxu0 %vm124_vm2, %v1698_v11  ;;  %1748 = vmatprep.mubr.bf16.mxu0 %v2528_v2  ;;  %v1812_v7 = vsel %vm124_vm2, %v1804_v49, 0 }
 0x232   :  { %v1697_v43 = vpack.c.bf16 %v1691_v40, %v1691_v40  ;;  %v1700_v52 = vpack.c.bf16 %v1694_v42, %v1694_v42  ;;  %v2033_v58 = vpop.permute.xlu0 %2032  ;;  %v1912_v59 = vpop.permute.xlu1 %1911  ;;  %1789 = vmatprep.mubr.bf16.mxu1 %v2528_v2 }
 0x233   :  { %v1918_v38 = vsel %vm725_vm6, %v1912_v59, %v1914_v47  ;;  %v1919_v39 = vsel %vm725_vm6, %v1910_v21, %v1912_v59 }
 0x234   :  { %v1922_v44 = vmul.f32 %v1918_v38, %v2842_v24  ;;  %2491 = vmatprep.subr.msk.bf16.mxu1 %vm124_vm2, %v1700_v52  ;;  %v1705_v30 = vsel %vm124_vm2, %v1697_v43, 0  ;;  %v1921_v24 = vmul.f32 %v1919_v39, %v2814_v56 }
 0x235   :  { %1717 = vmatpush1.bf16.msra.mxu0 %v1705_v30  ;;  %1758 = vmatpush1.bf16.msra.mxu1 %v1711_v13  ;;  %v2503_v30 = vld [vmem:[%s3296_s3 + $0x18] sm:$0xf] }
 0x236   :  { %v2037_v36 = vpop.permute.xlu0 %2036  ;;  %2496 = vmatprep.subr.msk.bf16.mxu1 %vm124_vm2, %v1807_v46  ;;  %v1916_v31 = vpop.permute.xlu1 %1915  ;;  %2494 = vmatprep.subr.msk.bf16.mxu0 %vm124_vm2, %v1805_v50  ;;  %v1928_v60 = vpack.c.bf16 %v1922_v44, %v1922_v44  ;;  %v1927_v3 = vpack.c.bf16 %v1921_v24, %v1921_v24 }
 0x237   :  { %v1917_v15 = vsel %vm725_vm6, %v1914_v47, %v1916_v31  ;;  %v1920_v6 = vsel %vm725_vm6, %v1916_v31, %v1910_v21 }
 0x238   :  { %v1923_v61 = vmul.f32 %v1917_v15, %v2845_v25  ;;  %v1924_v27 = vmul.f32 %v1920_v6, %v2836_v4  ;;  %2490 = vmatmul.mubr.msk.bf16.vlgmr.msra.gmra.mrb[48].mxu0 %vm120_vm3, %v2488_v48  ;;  %2492 = vmatmul.mubr.msk.bf16.vlgmr.msra.gmra.mrb[48].mxu1 %vm120_vm3, %v2488_v48 }
 0x239   :  { %1824 = vmatpush1.bf16.msra.mxu0 %v1812_v7  ;;  %1865 = vmatpush1.bf16.msra.mxu1 %v1818_v53 }
 0x23a   :  { %v1930_v56 = vpack.c.bf16 %v1924_v27, %v1924_v27  ;;  %v2156_v5 = vpop.permute.xlu0 %2155  ;;  %v2035_v29 = vpop.permute.xlu1 %2034  ;;  %2499 = vmatprep.subr.msk.bf16.mxu0 %vm124_vm2, %v1928_v60  ;;  %1855 = vmatprep.mubr.bf16.mxu0 %v2528_v2  ;;  %v1929_v4 = vpack.c.bf16 %v1923_v61, %v1923_v61  ;;  %v2513_v27 = vld [vmem:[%s3296_s3 + $0x20] sm:$0xf] }
 0x23b   :  { %v2041_v25 = vsel %vm872_vm7, %v2035_v29, %v2037_v36  ;;  %1896 = vmatprep.mubr.bf16.mxu1 %v2528_v2  ;;  %v2042_v18 = vsel %vm872_vm7, %v2033_v58, %v2035_v29 }
 0x23c   :  { %v2045_v19 = vmul.f32 %v2041_v25, %v2883_v55  ;;  %2501 = vmatprep.subr.msk.bf16.mxu1 %vm124_vm2, %v1930_v56  ;;  %v1935_v55 = vsel %vm124_vm2, %v1927_v3, 0  ;;  %v2044_v32 = vmul.f32 %v2042_v18, %v2871_v45  ;;  %v1941_v12 = vsel %vm124_vm2, %v1929_v4, 0 }
 0x23e   :  { %v2051_v21 = vpack.c.bf16 %v2045_v19, %v2045_v19  ;;  %v2160_v10 = vpop.permute.xlu0 %2159  ;;  %v2039_v26 = vpop.permute.xlu1 %2038 }
 0x23f   :  { %v2040_v63 = vsel %vm872_vm7, %v2037_v36, %v2039_v26  ;;  %v2043_v14 = vsel %vm872_vm7, %v2039_v26, %v2033_v58 }
 0x240   :  { %v2046_v17 = vmul.f32 %v2040_v63, %v2886_v57  ;;  %v2047_v20 = vmul.f32 %v2043_v14, %v2880_v54  ;;  %2495 = vmatmul.mubr.msk.bf16.vlgmr.msra.gmra.mrb[52].mxu0 %vm120_vm3, %v2493_v16  ;;  %2497 = vmatmul.mubr.msk.bf16.vlgmr.msra.gmra.mrb[52].mxu1 %vm120_vm3, %v2493_v16  ;;  %v2050_v54 = vpack.c.bf16 %v2044_v32, %v2044_v32 }
 0x241   :  { %1947 = vmatpush1.bf16.msra.mxu0 %v1935_v55  ;;  %1988 = vmatpush1.bf16.msra.mxu1 %v1941_v12 }
 0x242   :  { %v2053_v11 = vpack.c.bf16 %v2047_v20, %v2047_v20  ;;  %2504 = vmatprep.subr.msk.bf16.mxu0 %vm124_vm2, %v2051_v21  ;;  %v2158_v47 = vpop.permute.xlu1 %2157  ;;  %1978 = vmatprep.mubr.bf16.mxu0 %v2528_v2  ;;  %v2052_v57 = vpack.c.bf16 %v2046_v17, %v2046_v17  ;;  %v2279_v37 = vpop.permute.xlu0 %2278  ;;  %v2058_v49 = vsel %vm124_vm2, %v2050_v54, 0 }
 0x243   :  { %v2164_v45 = vsel %vm1019_vm8, %v2158_v47, %v2160_v10  ;;  %2019 = vmatprep.mubr.bf16.mxu1 %v2528_v2  ;;  %v2165_v28 = vsel %vm1019_vm8, %v2156_v5, %v2158_v47 }
 0x244   :  { %v2168_v41 = vmul.f32 %v2164_v45, %v2922_v34  ;;  %2506 = vmatprep.subr.msk.bf16.mxu1 %vm124_vm2, %v2053_v11  ;;  %v2167_v43 = vmul.f32 %v2165_v28, %v2910_v0  ;;  %v2064_v38 = vsel %vm124_vm2, %v2052_v57, 0 }
 0x246   :  { %v2174_v40 = vpack.c.bf16 %v2168_v41, %v2168_v41  ;;  %v2162_v42 = vpop.permute.xlu1 %2161  ;;  %v2283_v0 = vpop.permute.xlu0 %2282 }
 0x247   :  { %v2163_v52 = vsel %vm1019_vm8, %v2160_v10, %v2162_v42  ;;  %v2166_v58 = vsel %vm1019_vm8, %v2162_v42, %v2156_v5 }
 0x248   :  { %v2169_v59 = vmul.f32 %v2163_v52, %v2925_v35  ;;  %v2170_v34 = vmul.f32 %v2166_v58, %v2919_v33  ;;  %2500 = vmatmul.mubr.msk.bf16.vlgmr.msra.gmra.mrb[56].mxu0 %vm120_vm3, %v2498_v23  ;;  %2502 = vmatmul.mubr.msk.bf16.vlgmr.msra.gmra.mrb[56].mxu1 %vm120_vm3, %v2498_v23  ;;  %v2173_v35 = vpack.c.bf16 %v2167_v43, %v2167_v43 }
 0x249   :  { %2070 = vmatpush1.bf16.msra.mxu0 %v2058_v49  ;;  %2111 = vmatpush1.bf16.msra.mxu1 %v2064_v38 }
 0x24a   :  { %v2176_v46 = vpack.c.bf16 %v2170_v34, %v2170_v34  ;;  %2509 = vmatprep.subr.msk.bf16.mxu0 %vm124_vm2, %v2174_v40  ;;  %v2281_v50 = vpop.permute.xlu1 %2280  ;;  %2101 = vmatprep.mubr.bf16.mxu0 %v2528_v2  ;;  %v2175_v51 = vpack.c.bf16 %v2169_v59, %v2169_v59  ;;  %v2181_v24 = vsel %vm124_vm2, %v2173_v35, 0 }
 0x24b   :  { %v2287_v33 = vsel %vm1166_vm9, %v2281_v50, %v2283_v0  ;;  %2142 = vmatprep.mubr.bf16.mxu1 %v2528_v2  ;;  %v2288_v44 = vsel %vm1166_vm9, %v2279_v37, %v2281_v50 }
 0x24c   :  { %v2291_v39 = vmul.f32 %v2287_v33, %v2961_v9  ;;  %2511 = vmatprep.subr.msk.bf16.mxu1 %vm124_vm2, %v2176_v46  ;;  %v2290_v9 = vmul.f32 %v2288_v44, %v2949_v62  ;;  %v2187_v7 = vsel %vm124_vm2, %v2175_v51, 0 }
 0x24e   :  { %v2297_v13 = vpack.c.bf16 %v2291_v39, %v2291_v39  ;;  %v2285_v48 = vpop.permute.xlu1 %2284  ;;  %v2296_v8 = vpack.c.bf16 %v2290_v9, %v2290_v9 }
 0x24f   :  { %v2286_v36 = vsel %vm1166_vm9, %v2283_v0, %v2285_v48  ;;  %v2289_v31 = vsel %vm1166_vm9, %v2285_v48, %v2279_v37 }
 0x250   :  { %v2292_v15 = vmul.f32 %v2286_v36, %v2964_v1  ;;  %v2293_v6 = vmul.f32 %v2289_v31, %v2958_v22  ;;  %2505 = vmatmul.mubr.msk.bf16.vlgmr.msra.gmra.mrb[60].mxu0 %vm120_vm3, %v2503_v30  ;;  %2507 = vmatmul.mubr.msk.bf16.vlgmr.msra.gmra.mrb[60].mxu1 %vm120_vm3, %v2503_v30  ;;  %v2508_v22 = vld [vmem:[%s3296_s3 + $0x1c] sm:$0xf]  ;;  %v2304_v1 = vsel %vm124_vm2, %v2296_v8, 0 }
 0x251   :  { %2193 = vmatpush1.bf16.msra.mxu0 %v2181_v24  ;;  %2234 = vmatpush1.bf16.msra.mxu1 %v2187_v7 }
 0x252   :  { %v2299_v60 = vpack.c.bf16 %v2293_v6, %v2293_v6  ;;  %2514 = vmatprep.subr.msk.bf16.mxu0 %vm124_vm2, %v2297_v13  ;;  %2224 = vmatprep.mubr.bf16.mxu0 %v2528_v2  ;;  %v2298_v62 = vpack.c.bf16 %v2292_v15, %v2292_v15 }
 0x253   :  { %2265 = vmatprep.mubr.bf16.mxu1 %v2528_v2 }
 0x254   :  { %2516 = vmatprep.subr.msk.bf16.mxu1 %vm124_vm2, %v2299_v60  ;;  %v2310_v61 = vsel %vm124_vm2, %v2298_v62, 0 }
 0x258   :  { %2510 = vmatmul.mubr.msk.bf16.vlgmr.msra.gmra.mrb[64].mxu0 %vm120_vm3, %v2508_v22  ;;  %2512 = vmatmul.mubr.msk.bf16.vlgmr.msra.gmra.mrb[64].mxu1 %vm120_vm3, %v2508_v22 }
 0x259   :  { %2316 = vmatpush1.bf16.msra.mxu0 %v2304_v1  ;;  %2357 = vmatpush1.bf16.msra.mxu1 %v2310_v61 }
 0x25a   :  { %2347 = vmatprep.mubr.bf16.mxu0 %v2528_v2  ;;  %2388 = vmatprep.mubr.bf16.mxu1 %v2528_v2 }
 0x260   :  { %2515 = vmatmul.mubr.msk.bf16.vlgmr.msra.gmra.mrb[68].mxu0 %vm120_vm3, %v2513_v27  ;;  %2517 = vmatmul.mubr.msk.bf16.vlgmr.msra.gmra.mrb[68].mxu1 %vm120_vm3, %v2513_v27 }
 0x2f3   :  { %v1411_v53 = vpop.f32.mrb[36].mxu0  ;;  %v1452_v56 = vpop.f32.mrb[36].mxu1 }
 0x2f4   :  { %v1413_v5 = vpop.f32.mrb[37].mxu0  ;;  %v1454_v29 = vpop.f32.mrb[37].mxu1 }
 0x2f5   :  { %v1415_v3 = vpop.f32.mrb[38].mxu0  ;;  %v1456_v25 = vpop.f32.mrb[38].mxu1 }
 0x2f6   :  { %v1416_v4 = vpop.f32.mrb[39].mxu0  ;;  %v1457_v19 = vpop.f32.mrb[39].mxu1 }
 0x2fb   :  { %v1508_v18 = vpop.f32.mrb[40].mxu0  ;;  %v1549_v16 = vpop.f32.mrb[40].mxu1 }
 0x2fc   :  { %v1509_v21 = vadd.f32 %v1508_v18, %v1411_v53  ;;  %v1550_v2 = vadd.f32 %v1549_v16, %v1452_v56  ;;  %v1510_v10 = vpop.f32.mrb[41].mxu0  ;;  %v1551_v26 = vpop.f32.mrb[41].mxu1 }
 0x2fd   :  { %v1511_v63 = vadd.f32 %v1510_v10, %v1413_v5  ;;  %v1552_v14 = vadd.f32 %v1551_v26, %v1454_v29  ;;  %v1512_v55 = vpop.f32.mrb[42].mxu0  ;;  %v1553_v32 = vpop.f32.mrb[42].mxu1 }
 0x2fe   :  { %v1513_v17 = vpop.f32.mrb[43].mxu0  ;;  %v1554_v20 = vpop.f32.mrb[43].mxu1 }
 0x303   :  { %v1627_v12 = vpop.f32.mrb[44].mxu0  ;;  %v1668_v11 = vpop.f32.mrb[44].mxu1 }
 0x304   :  { %v1675_v47 = vadd.f32 %v1627_v12, %v1509_v21  ;;  %v1677_v45 = vadd.f32 %v1668_v11, %v1550_v2  ;;  %v1629_v54 = vpop.f32.mrb[45].mxu0  ;;  %v1670_v57 = vpop.f32.mrb[45].mxu1 }
 0x305   :  { %v1676_v37 = vadd.f32 %v1629_v54, %v1511_v63  ;;  %v1678_v28 = vadd.f32 %v1670_v57, %v1552_v14  ;;  %v1631_v41 = vpop.f32.mrb[46].mxu0  ;;  %v1672_v23 = vpop.f32.mrb[46].mxu1 }
 0x306   :  { %v1632_v40 = vpop.f32.mrb[47].mxu0  ;;  %v1673_v42 = vpop.f32.mrb[47].mxu1 }
 0x307   :  { %v2405_v41 = vpop.permute.xlu0 %2404 }
 0x30b   :  { %v1750_v43 = vpop.f32.mrb[48].mxu0  ;;  %v1791_v52 = vpop.f32.mrb[48].mxu1 }
 0x30c   :  { %v1798_v58 = vadd.f32 %v1750_v43, %v1675_v47  ;;  %v1800_v59 = vadd.f32 %v1791_v52, %v1677_v45  ;;  %v1752_v34 = vpop.f32.mrb[49].mxu0  ;;  %v1793_v49 = vpop.f32.mrb[49].mxu1 }
 0x30d   :  { %v1799_v38 = vadd.f32 %v1752_v34, %v1676_v37  ;;  %v1801_v0 = vadd.f32 %v1793_v49, %v1678_v28  ;;  %v1754_v46 = vpop.f32.mrb[50].mxu0  ;;  %v1795_v50 = vpop.f32.mrb[50].mxu1 }
 0x30e   :  { %v1755_v35 = vpop.f32.mrb[51].mxu0  ;;  %v1796_v33 = vpop.f32.mrb[51].mxu1 }
 0x313   :  { %v1857_v51 = vpop.f32.mrb[52].mxu0  ;;  %v1898_v39 = vpop.f32.mrb[52].mxu1 }
 0x314   :  { %v1905_v44 = vadd.f32 %v1857_v51, %v1798_v58  ;;  %v1907_v30 = vadd.f32 %v1898_v39, %v1800_v59  ;;  %v1859_v13 = vpop.f32.mrb[53].mxu0  ;;  %v1900_v48 = vpop.f32.mrb[53].mxu1 }
 0x315   :  { %v1906_v36 = vadd.f32 %v1859_v13, %v1799_v38  ;;  %v1908_v31 = vadd.f32 %v1900_v48, %v1801_v0  ;;  %v1861_v24 = vpop.f32.mrb[54].mxu0  ;;  %v1902_v9 = vpop.f32.mrb[54].mxu1 }
 0x316   :  { %v1862_v15 = vpop.f32.mrb[55].mxu0  ;;  %v1903_v6 = vpop.f32.mrb[55].mxu1 }
 0x31b   :  { %v1980_v7 = vpop.f32.mrb[56].mxu0  ;;  %v2021_v60 = vpop.f32.mrb[56].mxu1 }
 0x31c   :  { %v2028_v8 = vadd.f32 %v1980_v7, %v1905_v44  ;;  %v2030_v62 = vadd.f32 %v2021_v60, %v1907_v30  ;;  %v1982_v22 = vpop.f32.mrb[57].mxu0  ;;  %v2023_v1 = vpop.f32.mrb[57].mxu1 }
 0x31d   :  { %v2029_v61 = vadd.f32 %v1982_v22, %v1906_v36  ;;  %v2031_v27 = vadd.f32 %v2023_v1, %v1908_v31  ;;  %v1984_v53 = vpop.f32.mrb[58].mxu0  ;;  %v2025_v56 = vpop.f32.mrb[58].mxu1 }
 0x31e   :  { %v1985_v5 = vpop.f32.mrb[59].mxu0  ;;  %v2026_v29 = vpop.f32.mrb[59].mxu1 }
 0x323   :  { %v2103_v3 = vpop.f32.mrb[60].mxu0  ;;  %v2144_v25 = vpop.f32.mrb[60].mxu1 }
 0x324   :  { %v2151_v4 = vadd.f32 %v2103_v3, %v2028_v8  ;;  %v2153_v19 = vadd.f32 %v2144_v25, %v2030_v62  ;;  %v2105_v18 = vpop.f32.mrb[61].mxu0  ;;  %v2146_v16 = vpop.f32.mrb[61].mxu1 }
 0x325   :  { %v2152_v21 = vadd.f32 %v2105_v18, %v2029_v61  ;;  %v2154_v2 = vadd.f32 %v2146_v16, %v2031_v27  ;;  %v2107_v10 = vpop.f32.mrb[62].mxu0  ;;  %v2148_v26 = vpop.f32.mrb[62].mxu1 }
 0x326   :  { %v2108_v63 = vpop.f32.mrb[63].mxu0  ;;  %v2149_v14 = vpop.f32.mrb[63].mxu1 }
 0x32b   :  { %v2226_v55 = vpop.f32.mrb[64].mxu0  ;;  %v2267_v32 = vpop.f32.mrb[64].mxu1 }
 0x32c   :  { %v2274_v17 = vadd.f32 %v2226_v55, %v2151_v4  ;;  %v2276_v20 = vadd.f32 %v2267_v32, %v2153_v19  ;;  %v2228_v12 = vpop.f32.mrb[65].mxu0  ;;  %v2269_v11 = vpop.f32.mrb[65].mxu1 }
 0x32d   :  { %v2275_v47 = vadd.f32 %v2228_v12, %v2152_v21  ;;  %v2277_v45 = vadd.f32 %v2269_v11, %v2154_v2  ;;  %v2230_v54 = vpop.f32.mrb[66].mxu0  ;;  %v2271_v57 = vpop.f32.mrb[66].mxu1 }
 0x32e   :  { %v2231_v37 = vpop.f32.mrb[67].mxu0  ;;  %v2272_v28 = vpop.f32.mrb[67].mxu1 }
 0x333   :  { %v2349_v23 = vpop.f32.mrb[68].mxu0  ;;  %v2390_v40 = vpop.f32.mrb[68].mxu1 }
 0x334   :  { %v2397_v42 = vadd.f32 %v2349_v23, %v2274_v17  ;;  %v2399_v43 = vadd.f32 %v2390_v40, %v2276_v20  ;;  %v2351_v52 = vpop.f32.mrb[69].mxu0  ;;  %v2392_v58 = vpop.f32.mrb[69].mxu1 }
 0x335   :  { %v2398_v59 = vadd.f32 %v2351_v52, %v2275_v47  ;;  %v2400_v34 = vadd.f32 %v2392_v58, %v2277_v45  ;;  %v2353_v49 = vpop.f32.mrb[70].mxu0  ;;  %v2394_v38 = vpop.f32.mrb[70].mxu1 }
 0x336   :  { %v2407_v0 = vadd.f32 %v2405_v41, %v2397_v42  ;;  %v2409_v46 = vadd.f32 %v2405_v41, %v2399_v43  ;;  %v2354_v50 = vpop.f32.mrb[71].mxu0  ;;  %v2395_v35 = vpop.f32.mrb[71].mxu1 }
 0x337   :  { %v2408_v33 = vadd.f32 %v2405_v41, %v2398_v59  ;;  %v2410_v51 = vadd.f32 %v2405_v41, %v2400_v34 }
 0x338   :  { %v2411_v39 = vmax.f32 %v2407_v0, 0.0  ;;  %v2413_v44 = vmax.f32 %v2409_v46, 0.0 }
 0x339   :  { %v2412_v30 = vmax.f32 %v2408_v33, 0.0  ;;  %v2414_v13 = vmax.f32 %v2410_v51, 0.0 }
 0x33a   :  { %2415 = vst [vmem:[%s3297_s6] sm:$0xff] %v2411_v39  ;;  %2417 = vst [vmem:[%s3297_s6 + $0x10] sm:$0xff] %v2413_v44 }
 0x33b   :  { %2416 = vst [vmem:[%s3297_s6 + $0x8] sm:$0xff] %v2412_v30  ;;  %2418 = vst [vmem:[%s3297_s6 + $0x18] sm:$0xff] %v2414_v13 }

</bundles_post_ra>
